<compile_context>
chip_gen: v5e
topology: v5e:2x2
jax: 0.10.0
libtpu: 0.0.40
codegen_flags: <defaults>
</compile_context>

<pallas_src>
import functools
import math

import jax
import jax.numpy as jnp
from jax import lax
from jax.experimental import pallas as pl
from jax.experimental.pallas import tpu as pltpu

F32 = jnp.float32
LANE = 128


def _round_up(n, m):
    return ((n + m - 1) // m) * m


def _full_spec(shape):
    # single-block spec covering the whole array (grid=(1,))
    return pl.BlockSpec(shape, lambda i, _s=shape: (0,) * len(_s))


def _grid1_call(kernel, out_shape, inputs):
    in_specs = [_full_spec(x.shape) for x in inputs]
    if isinstance(out_shape, (list, tuple)):
        out_shape = tuple(out_shape)
        out_specs = tuple(_full_spec(s.shape) for s in out_shape)
    else:
        out_specs = _full_spec(out_shape.shape)
    return pl.pallas_call(
        kernel,
        out_shape=out_shape,
        grid=(1,),
        in_specs=in_specs,
        out_specs=out_specs,
        compiler_params=pltpu.CompilerParams(
            dimension_semantics=("arbitrary",)),
    )(*inputs)


# ---------------------------------------------------------------------------
# Kernel 1: fused MolecularGCNWithGRU
#   h = node_feats @ W_init                      (Linear, bias=False, padded col)
#   per layer (unrolled, h stays resident in VMEM/vregs):
#     agg   = adj @ h                            (sum over incoming edges)
#     x     = agg @ W + b  (+ optional activation; Main_model passes None)
#     GRUCell(x, h) with per-gate matmuls (PyTorch gate order r, z, n)
#
# Zero-pad invariant: padded feature columns of every weight/bias are zero, so
# padded columns of h stay exactly zero through init, aggregation, linear and
# the GRU ((1-z)*n + z*h with n=0, h=0 on padded cols) -> numerics identical
# to the unpadded module.
# ---------------------------------------------------------------------------
def _ligand_kernel(adj_ref, x_ref, w_init_ref,
                   w_ref, b_ref,
                   wir_ref, wiz_ref, win_ref,
                   whr_ref, whz_ref, whn_ref,
                   bir_ref, biz_ref, bin_ref,
                   bhr_ref, bhz_ref, bhn_ref,
                   o_ref, *, num_layers, use_relu):
    adj = adj_ref[...]
    h = jnp.dot(x_ref[...], w_init_ref[...], preferred_element_type=F32)
    for l in range(num_layers):                      # unrolled: h never leaves VMEM
        agg = jnp.dot(adj, h, preferred_element_type=F32)
        x = jnp.dot(agg, w_ref[l], preferred_element_type=F32) + b_ref[l]
        if use_relu:                                 # Main_model: activation=None
            x = jnp.maximum(x, 0.0)
        # GRU gates via per-gate matmuls (no sub-128-lane slicing of a 3H tensor)
        r = jax.nn.sigmoid(
            jnp.dot(x, wir_ref[l], preferred_element_type=F32) + bir_ref[l]
            + jnp.dot(h, whr_ref[l], preferred_element_type=F32) + bhr_ref[l])
        z = jax.nn.sigmoid(
            jnp.dot(x, wiz_ref[l], preferred_element_type=F32) + biz_ref[l]
            + jnp.dot(h, whz_ref[l], preferred_element_type=F32) + bhz_ref[l])
        n = jnp.tanh(
            jnp.dot(x, win_ref[l], preferred_element_type=F32) + bin_ref[l]
            + r * (jnp.dot(h, whn_ref[l], preferred_element_type=F32) + bhn_ref[l]))
        h = (1.0 - z) * n + z * h
    o_ref[...] = h


def ligand_forward(adj, node_feats, lp, batch_size, use_relu=False):
    n, fin = node_feats.shape
    in_pad, emb = lp["w_init"].shape
    x = jnp.zeros((n, in_pad), F32).at[:, :fin].set(node_feats)   # pad lanes
    kernel = functools.partial(_ligand_kernel,
                               num_layers=lp["w"].shape[0],
                               use_relu=use_relu)
    inputs = [adj, x, lp["w_init"], lp["w"], lp["b"],
              lp["w_ir"], lp["w_iz"], lp["w_in"],
              lp["w_hr"], lp["w_hz"], lp["w_hn"],
              lp["b_ir"], lp["b_iz"], lp["b_in"],
              lp["b_hr"], lp["b_hz"], lp["b_hn"]]
    h = _grid1_call(kernel, jax.ShapeDtypeStruct((n, emb), F32), inputs)
    # node_feats.view(batch_size, -1, output_feats); nodes are graph-contiguous
    return h.reshape(batch_size, -1, emb)


# ---------------------------------------------------------------------------
# Kernel 2: fused Protein_global
#   x += positional encoding; 3x (GCNConv -> ReLU); fc_g1 -> ReLU; fc_g2 -> ReLU
#   (dropout is identity in eval/inference mode)
# ---------------------------------------------------------------------------
def _protein_kernel(x_ref, pe_ref, a_ref,
                    w1_ref, b1_ref, w2_ref, b2_ref, w3_ref, b3_ref,
                    wg1_ref, bg1_ref, wg2_ref, bg2_ref, o_ref):
    a = a_ref[...]
    xt = x_ref[...] + pe_ref[...]
    xt = jnp.maximum(
        jnp.dot(a, jnp.dot(xt, w1_ref[...], preferred_element_type=F32),
                preferred_element_type=F32) + b1_ref[...], 0.0)
    xt = jnp.maximum(
        jnp.dot(a, jnp.dot(xt, w2_ref[...], preferred_element_type=F32),
                preferred_element_type=F32) + b2_ref[...], 0.0)
    xt = jnp.maximum(
        jnp.dot(a, jnp.dot(xt, w3_ref[...], preferred_element_type=F32),
                preferred_element_type=F32) + b3_ref[...], 0.0)
    xt = jnp.maximum(
        jnp.dot(xt, wg1_ref[...], preferred_element_type=F32) + bg1_ref[...], 0.0)
    # TODO(synk): nn.Dropout(0.2) is stochastic in train mode; implemented as
    #             identity (eval/inference semantics).
    xt = jnp.maximum(
        jnp.dot(xt, wg2_ref[...], preferred_element_type=F32) + bg2_ref[...], 0.0)
    o_ref[...] = xt


def positional_encoding_jnp(length, d_model):
    position = jnp.arange(length, dtype=F32)[:, None]
    div_term = jnp.exp(jnp.arange(0, d_model, 2, dtype=F32)
                       * (-math.log(10000.0) / d_model))
    pe = jnp.zeros((length, d_model), F32)
    pe = pe.at[:, 0::2].set(jnp.sin(position * div_term))
    pe = pe.at[:, 1::2].set(jnp.cos(position * div_term))
    return pe


def protein_forward(x, a_hat, pp):
    n, d = x.shape
    p_pad = pp["w1"].shape[0]
    pe = positional_encoding_jnp(n, d)
    xp = jnp.zeros((n, p_pad), F32).at[:, :d].set(x)
    pep = jnp.zeros((n, p_pad), F32).at[:, :d].set(pe)
    inputs = [xp, pep, a_hat,
              pp["w1"], pp["b1"], pp["w2"], pp["b2"], pp["w3"], pp["b3"],
              pp["wg1"], pp["bg1"], pp["wg2"], pp["bg2"]]
    pemb = pp["wg2"].shape[1]
    out = _grid1_call(_protein_kernel,
                      jax.ShapeDtypeStruct((n, pemb), F32), inputs)
    return out[None]            # unsqueeze(0) -> (1, N_p, pemb)


# ---------------------------------------------------------------------------
# Kernel 3: fused TransformerBlock + MLPDecoder + output_layer
#   protein self-attention -> LayerNorm -> cross-attention (protein Q, ligand
#   K/V) -> LayerNorm -> FFN -> mean-pool over residues -> output linear (=f)
#   -> MLP decoder -> final score. (No residual connections, as in the module.)
# ---------------------------------------------------------------------------
def _layernorm(x, gamma, beta, eps=1e-5):
    mu = jnp.mean(x, axis=-1, keepdims=True)
    var = jnp.mean(jnp.square(x - mu), axis=-1, keepdims=True)
    return (x - mu) * lax.rsqrt(var + eps) * gamma + beta


def _mha(q_in, kv_in, wq_ref, bq_ref, wk_ref, bk_ref, wv_ref, bv_ref,
         wo_ref, bo_ref, num_heads, head_dim):
    """nn.MultiheadAttention (batch=1) with per-head projection weights.

    out_proj is applied as a sum of per-head (Dh, D) blocks, so the head
    outputs never need to be concatenated / lane-sliced."""
    scale = 1.0 / math.sqrt(head_dim)
    out = None
    attn_sum = None
    for h in range(num_heads):
        qh = jnp.dot(q_in, wq_ref[h], preferred_element_type=F32) + bq_ref[h]
        kh = jnp.dot(kv_in, wk_ref[h], preferred_element_type=F32) + bk_ref[h]
        vh = jnp.dot(kv_in, wv_ref[h], preferred_element_type=F32) + bv_ref[h]
        s = lax.dot_general(qh, kh, (((1,), (1,)), ((), ())),
                            preferred_element_type=F32) * scale
        s = s - jnp.max(s, axis=-1, keepdims=True)
        p = jnp.exp(s)
        p = p / jnp.sum(p, axis=-1, keepdims=True)
        oh = jnp.dot(p, vh, preferred_element_type=F32)
        contrib = jnp.dot(oh, wo_ref[h], preferred_element_type=F32)
        out = contrib if out is None else out + contrib
        attn_sum = p if attn_sum is None else attn_sum + p
    out = out + bo_ref[...]
    attn_mean = attn_sum * (1.0 / num_heads)     # torch averages over heads
    return out, attn_mean


def _trans_mlp_kernel(prot_ref, lig_ref,
                      swq, sbq, swk, sbk, swv, sbv, swo, sbo,
                      n1g, n1b,
                      cwq, cbq, cwk, cbk, cwv, cbv, cwo, cbo,
                      n2g, n2b,
                      ffn_w1, ffn_b1, ffn_w2, ffn_b2,
                      ow, ob,
                      fc1_w, fc1_b, fc2_w, fc2_b, fc3_w, fc3_b,
                      out_w, out_b,
                      f_ref, score_ref, attn_ref,
                      *, num_heads, head_dim):
    prot = prot_ref[...]
    lig = lig_ref[...]

    # protein self-attention + norm1 (no residual in the reference module)
    p_sa, _ = _mha(prot, prot, swq, sbq, swk, sbk, swv, sbv, swo, sbo,
                   num_heads, head_dim)
    p_sa = _layernorm(p_sa, n1g[...], n1b[...])

    # cross-attention (protein queries, ligand keys/values) + norm2
    p_ca, attn = _mha(p_sa, lig, cwq, cbq, cwk, cbk, cwv, cbv, cwo, cbo,
                      num_heads, head_dim)
    p_ca = _layernorm(p_ca, n2g[...], n2b[...])

    # FFN
    hid = jnp.maximum(
        jnp.dot(p_ca, ffn_w1[...], preferred_element_type=F32) + ffn_b1[...], 0.0)
    ffn_out = jnp.dot(hid, ffn_w2[...], preferred_element_type=F32) + ffn_b2[...]

    # mean-pool over the protein sequence axis, then output linear -> f
    pooled = jnp.mean(ffn_out, axis=0, keepdims=True)            # (1, D)
    f = jnp.dot(pooled, ow[...], preferred_element_type=F32) + ob[...]

    # MLP decoder + output layer -> score
    x = jnp.maximum(jnp.dot(f, fc1_w[...], preferred_element_type=F32)
                    + fc1_b[...], 0.0)
    x = jnp.maximum(jnp.dot(x, fc2_w[...], preferred_element_type=F32)
                    + fc2_b[...], 0.0)
    x = jnp.dot(x, fc3_w[...], preferred_element_type=F32) + fc3_b[...]
    score = jnp.sum(x * out_w[...], axis=-1, keepdims=True) + out_b[...]

    f_ref[...] = f
    score_ref[...] = score
    attn_ref[...] = attn


def trans_mlp_forward(v_d, v_p, tp, mp, num_heads):
    # batch-first (B, L, D) -> seq-first (L, B, D); with B == 1 work on (L, D)
    lig = v_d[0]
    prot = v_p[0]
    d_model = prot.shape[1]
    head_dim = d_model // num_heads
    s, c = tp["self"], tp["cross"]
    inputs = [prot, lig,
              s["wq"], s["bq"], s["wk"], s["bk"], s["wv"], s["bv"],
              s["wo"], s["bo"],
              tp["n1g"], tp["n1b"],
              c["wq"], c["bq"], c["wk"], c["bk"], c["wv"], c["bv"],
              c["wo"], c["bo"],
              tp["n2g"], tp["n2b"],
              tp["ffn_w1"], tp["ffn_b1"], tp["ffn_w2"], tp["ffn_b2"],
              tp["ow"], tp["ob"],
              mp["fc1_w"], mp["fc1_b"], mp["fc2_w"], mp["fc2_b"],
              mp["fc3_w"], mp["fc3_b"],
              mp["out_w"], mp["out_b"]]
    mlp_in = tp["ow"].shape[1]
    out_shapes = (jax.ShapeDtypeStruct((1, mlp_in), F32),
                  jax.ShapeDtypeStruct((1, 1), F32),
                  jax.ShapeDtypeStruct((prot.shape[0], lig.shape[0]), F32))
    kernel = functools.partial(_trans_mlp_kernel,
                               num_heads=num_heads, head_dim=head_dim)
    f, score, attn = _grid1_call(kernel, out_shapes, inputs)
    return f, score, attn[None]


# ---------------------------------------------------------------------------
# Full model forward
# ---------------------------------------------------------------------------
def main_model_forward(params, cfg, ligand_adj, ligand_feats, ligand_batch_size,
                       protein_x, protein_a_hat, mode="train"):
    v_d = ligand_forward(ligand_adj, ligand_feats, params["ligand"],
                         ligand_batch_size, use_relu=False)  # activation=None
    v_p = protein_forward(protein_x, protein_a_hat, params["protein"])
    f, score, attn = trans_mlp_forward(v_d, v_p, params["trans"], params["mlp"],
                                       cfg["TRANS"]["HEAD"])
    if mode == "train":
        return v_d, v_p, f, score
    return v_d, v_p, score, attn


# ---------------------------------------------------------------------------
# Deterministic parameter initialization.
# Linear / GRU weights are stored pre-transposed as (in, out); GRU gate weights
# are stored per gate (the torch fused (3H, in) layout maps onto them by
# transposing and slicing rows [0:H]=r, [H:2H]=z, [2H:3H]=n).
# ---------------------------------------------------------------------------
def make_params(cfg, key):
    keys = iter(jax.random.split(key, 256))

    def dense(shape, scale=0.1):
        return scale * jax.random.normal(next(keys), shape, F32)

    # ---- ligand extractor (MolecularGCNWithGRU) ----
    in_feats = cfg["LIGAND"]["NODE_IN_FEATS"]
    emb = cfg["LIGAND"]["NODE_IN_EMBEDDING"]
    hidden = cfg["LIGAND"]["HIDDEN_LAYERS"]
    assert emb % LANE == 0 and all(h == emb for h in hidden), \
        "ligand embedding/hidden dims kept lane-dense and equal (GRUCell constraint)"
    in_pad = _round_up(in_feats, LANE)

    # init_transform: Linear(in_feats, emb, bias=False); padding=True zeroes the
    # last OUTPUT feature (torch weight[-1]) -> last column of transposed weight.
    w_init = jnp.zeros((in_pad, emb), F32).at[:in_feats, :].set(
        dense((in_feats, emb)))
    if cfg["LIGAND"]["PADDING"]:
        w_init = w_init.at[:, -1].set(0.0)

    num_layers = len(hidden)

    def stack(shape):
        return jnp.stack([dense(shape) for _ in range(num_layers)], axis=0)

    ligand = {
        "w_init": w_init,
        "w": stack((emb, emb)), "b": stack((1, emb)),
        "w_ir": stack((emb, emb)), "w_iz": stack((emb, emb)),
        "w_in": stack((emb, emb)),
        "w_hr": stack((emb, emb)), "w_hz": stack((emb, emb)),
        "w_hn": stack((emb, emb)),
        "b_ir": stack((1, emb)), "b_iz": stack((1, emb)), "b_in": stack((1, emb)),
        "b_hr": stack((1, emb)), "b_hz": stack((1, emb)), "b_hn": stack((1, emb)),
    }

    # ---- protein extractor (Protein_global) ----
    pdim = 26                       # fixed in the module
    pemb = cfg["PROTEIN"]["EMBEDDING_DIM"]
    assert pemb % LANE == 0
    p_pad = _round_up(pdim, LANE)
    d2, d3 = 2 * pdim, 4 * pdim     # 52, 104

    def pw(i, o):                   # zero-padded (p_pad, p_pad) weight
        return jnp.zeros((p_pad, p_pad), F32).at[:i, :o].set(dense((i, o)))

    def pb(o):                      # zero-padded (1, p_pad) bias
        return jnp.zeros((1, p_pad), F32).at[:, :o].set(dense((1, o)))

    protein = {
        "w1": pw(pdim, pdim), "b1": pb(pdim),
        "w2": pw(pdim, d2),   "b2": pb(d2),
        "w3": pw(d2, d3),     "b3": pb(d3),
        "wg1": jnp.zeros((p_pad, 1024), F32).at[:d3, :].set(dense((d3, 1024))),
        "bg1": dense((1, 1024)),
        "wg2": dense((1024, pemb)), "bg2": dense((1, pemb)),
    }

    # ---- TransformerBlock ----
    d_model = cfg["TRANS"]["IN_DIM"]
    n_heads = cfg["TRANS"]["HEAD"]
    mlp_in = cfg["DECODER"]["IN_DIM"]
    assert d_model % n_heads == 0 and d_model % LANE == 0
    assert d_model == hidden[-1] == pemb, \
        "transformer model_dim must match ligand/protein embedding dims"
    head_dim = d_model // n_heads

    def attn_params():
        return {
            "wq": dense((n_heads, d_model, head_dim)),
            "bq": dense((n_heads, 1, head_dim)),
            "wk": dense((n_heads, d_model, head_dim)),
            "bk": dense((n_heads, 1, head_dim)),
            "wv": dense((n_heads, d_model, head_dim)),
            "bv": dense((n_heads, 1, head_dim)),
            "wo": dense((n_heads, head_dim, d_model)),
            "bo": dense((1, d_model)),
        }

    trans = {
        "self": attn_params(), "cross": attn_params(),
        "n1g": jnp.ones((1, d_model), F32), "n1b": jnp.zeros((1, d_model), F32),
        "n2g": jnp.ones((1, d_model), F32), "n2b": jnp.zeros((1, d_model), F32),
        "ffn_w1": dense((d_model, 4 * d_model)), "ffn_b1": dense((1, 4 * d_model)),
        "ffn_w2": dense((4 * d_model, d_model)), "ffn_b2": dense((1, d_model)),
        "ow": dense((d_model, mlp_in)), "ob": dense((1, mlp_in)),
    }

    # ---- MLPDecoder + output_layer ----
    mlp_hidden = cfg["DECODER"]["HIDDEN_DIM"]
    mlp_out = cfg["DECODER"]["OUT_DIM"]
    mlp = {
        "fc1_w": dense((mlp_in, mlp_hidden)), "fc1_b": dense((1, mlp_hidden)),
        "fc2_w": dense((mlp_hidden, mlp_hidden)), "fc2_b": dense((1, mlp_hidden)),
        "fc3_w": dense((mlp_hidden, mlp_out)), "fc3_b": dense((1, mlp_out)),
        "out_w": dense((1, mlp_out)),   # torch layout (out=1, in=mlp_out)
        "out_b": dense((1, 1)),
    }

    return {"ligand": ligand, "protein": protein, "trans": trans, "mlp": mlp}


# ---------------------------------------------------------------------------
# Synthetic graph construction (replaces DGL / PyG graph objects)
# ---------------------------------------------------------------------------
def build_ligand_adjacency(key, batch_size, nodes_per_graph, p=0.3):
    n = batch_size * nodes_per_graph
    dense = (jax.random.uniform(key, (n, n)) < p).astype(F32)
    block = jnp.kron(jnp.eye(batch_size, dtype=F32),
                     jnp.ones((nodes_per_graph, nodes_per_graph), F32))
    return dense * block                      # adj[dst, src], block-diagonal


def build_gcn_adjacency(key, num_nodes, p=0.15):
    # dense equivalent of PyG GCNConv propagation: D^-1/2 (A + I) D^-1/2
    u = jax.random.uniform(key, (num_nodes, num_nodes))
    upper = jnp.triu((u < p).astype(F32), k=1)
    a = upper + upper.T + jnp.eye(num_nodes, dtype=F32)
    dinv = 1.0 / jnp.sqrt(jnp.sum(a, axis=1))
    return a * dinv[:, None] * dinv[None, :]


if __name__ == "__main__":
    cfg = {
        "LIGAND": {"NODE_IN_FEATS": 30, "NODE_IN_EMBEDDING": 128,
                   "HIDDEN_LAYERS": [128, 128], "PADDING": True},
        "PROTEIN": {"EMBEDDING_DIM": 128, "NUM_CAND": 1},
        "TRANS": {"IN_DIM": 128, "HEAD": 4},
        "DECODER": {"IN_DIM": 256, "HIDDEN_DIM": 256, "OUT_DIM": 128},
    }

    key = jax.random.PRNGKey(0)
    k_par, k_lfeat, k_ladj, k_px, k_padj = jax.random.split(key, 5)
    params = make_params(cfg, k_par)

    # ligand: one molecule graph of 16 atoms (batch 1, so the protein/ligand
    # cross-attention batch dims match, as the PyTorch model requires)
    batch_size, nodes_per_graph = 1, 16
    lig_feats = jax.random.normal(
        k_lfeat, (batch_size * nodes_per_graph, cfg["LIGAND"]["NODE_IN_FEATS"]),
        F32)
    lig_adj = build_ligand_adjacency(k_ladj, batch_size, nodes_per_graph)

    # protein: 64 residues with 26-dim features
    n_prot = 64
    prot_x = jax.random.normal(k_px, (n_prot, 26), F32)
    prot_a_hat = build_gcn_adjacency(k_padj, n_prot)

    v_d, v_p, f, score = main_model_forward(
        params, cfg, lig_adj, lig_feats, batch_size, prot_x, prot_a_hat,
        mode="train")
    v_d, v_p, f, score = jax.block_until_ready((v_d, v_p, f, score))

    assert v_d.shape == (batch_size, nodes_per_graph,
                         cfg["LIGAND"]["HIDDEN_LAYERS"][-1])
    assert v_p.shape == (1, n_prot, cfg["PROTEIN"]["EMBEDDING_DIM"])
    assert f.shape == (1, cfg["DECODER"]["IN_DIM"])
    assert score.shape == (1, 1)
    for t in (v_d, v_p, f, score):
        assert bool(jnp.all(jnp.isfinite(t)))
    print("KERNEL_OK")
</pallas_src>

<mosaic_0001>
module attributes {stable_mosaic.version = 11 : i64} {
  func.func @_ligand_kernel(%arg0: i32, %arg1: memref<16x16xf32, #tpu.memory_space<vmem>>, %arg2: memref<16x128xf32, #tpu.memory_space<vmem>>, %arg3: memref<128x128xf32, #tpu.memory_space<vmem>>, %arg4: memref<2x128x128xf32, #tpu.memory_space<vmem>>, %arg5: memref<2x1x128xf32, #tpu.memory_space<vmem>>, %arg6: memref<2x128x128xf32, #tpu.memory_space<vmem>>, %arg7: memref<2x128x128xf32, #tpu.memory_space<vmem>>, %arg8: memref<2x128x128xf32, #tpu.memory_space<vmem>>, %arg9: memref<2x128x128xf32, #tpu.memory_space<vmem>>, %arg10: memref<2x128x128xf32, #tpu.memory_space<vmem>>, %arg11: memref<2x128x128xf32, #tpu.memory_space<vmem>>, %arg12: memref<2x1x128xf32, #tpu.memory_space<vmem>>, %arg13: memref<2x1x128xf32, #tpu.memory_space<vmem>>, %arg14: memref<2x1x128xf32, #tpu.memory_space<vmem>>, %arg15: memref<2x1x128xf32, #tpu.memory_space<vmem>>, %arg16: memref<2x1x128xf32, #tpu.memory_space<vmem>>, %arg17: memref<2x1x128xf32, #tpu.memory_space<vmem>>, %arg18: memref<16x128xf32, #tpu.memory_space<vmem>>) attributes {dimension_semantics = [#tpu.dimension_semantics<arbitrary>], iteration_bounds = array<i64: 1>, scalar_prefetch = 0 : i64, scratch_operands = 0 : i64, tpu.core_type = #tpu.core_type<tc>, window_params = [{pipeline_mode = #tpu.pipeline_mode<synchronous>, transform_indices = @transform_0, window_bounds = array<i64: 16, 16>}, {pipeline_mode = #tpu.pipeline_mode<synchronous>, transform_indices = @transform_1, window_bounds = array<i64: 16, 128>}, {pipeline_mode = #tpu.pipeline_mode<synchronous>, transform_indices = @transform_2, window_bounds = array<i64: 128, 128>}, {pipeline_mode = #tpu.pipeline_mode<synchronous>, transform_indices = @transform_3, window_bounds = array<i64: 2, 128, 128>}, {pipeline_mode = #tpu.pipeline_mode<synchronous>, transform_indices = @transform_4, window_bounds = array<i64: 2, 1, 128>}, {pipeline_mode = #tpu.pipeline_mode<synchronous>, transform_indices = @transform_5, window_bounds = array<i64: 2, 128, 128>}, {pipeline_mode = #tpu.pipeline_mode<synchronous>, transform_indices = @transform_6, window_bounds = array<i64: 2, 128, 128>}, {pipeline_mode = #tpu.pipeline_mode<synchronous>, transform_indices = @transform_7, window_bounds = array<i64: 2, 128, 128>}, {pipeline_mode = #tpu.pipeline_mode<synchronous>, transform_indices = @transform_8, window_bounds = array<i64: 2, 128, 128>}, {pipeline_mode = #tpu.pipeline_mode<synchronous>, transform_indices = @transform_9, window_bounds = array<i64: 2, 128, 128>}, {pipeline_mode = #tpu.pipeline_mode<synchronous>, transform_indices = @transform_10, window_bounds = array<i64: 2, 128, 128>}, {pipeline_mode = #tpu.pipeline_mode<synchronous>, transform_indices = @transform_11, window_bounds = array<i64: 2, 1, 128>}, {pipeline_mode = #tpu.pipeline_mode<synchronous>, transform_indices = @transform_12, window_bounds = array<i64: 2, 1, 128>}, {pipeline_mode = #tpu.pipeline_mode<synchronous>, transform_indices = @transform_13, window_bounds = array<i64: 2, 1, 128>}, {pipeline_mode = #tpu.pipeline_mode<synchronous>, transform_indices = @transform_14, window_bounds = array<i64: 2, 1, 128>}, {pipeline_mode = #tpu.pipeline_mode<synchronous>, transform_indices = @transform_15, window_bounds = array<i64: 2, 1, 128>}, {pipeline_mode = #tpu.pipeline_mode<synchronous>, transform_indices = @transform_16, window_bounds = array<i64: 2, 1, 128>}, {pipeline_mode = #tpu.pipeline_mode<synchronous>, transform_indices = @transform_17, window_bounds = array<i64: 16, 128>}]} {
    %c0 = arith.constant 0 : index
    %c0_0 = arith.constant 0 : index
    %0 = vector.load %arg1[%c0, %c0_0] : memref<16x16xf32, #tpu.memory_space<vmem>>, vector<16x16xf32>
    %c0_1 = arith.constant 0 : index
    %c0_2 = arith.constant 0 : index
    %1 = vector.load %arg2[%c0_1, %c0_2] : memref<16x128xf32, #tpu.memory_space<vmem>>, vector<16x128xf32>
    %c0_3 = arith.constant 0 : index
    %c0_4 = arith.constant 0 : index
    %2 = vector.load %arg3[%c0_3, %c0_4] : memref<128x128xf32, #tpu.memory_space<vmem>>, vector<128x128xf32>
    %cst = arith.constant dense<0.000000e+00> : vector<16x128xf32>
    %3 = tpu.matmul %1, %2, %cst {dimension_numbers = #tpu.dot_dimension_numbers<[1], [0], [0], [1], [0, 0, 1, 1], [], []>} : vector<16x128xf32>, vector<128x128xf32>, vector<16x128xf32> -> vector<16x128xf32>
    %cst_5 = arith.constant dense<0.000000e+00> : vector<16x128xf32>
    %4 = tpu.matmul %0, %3, %cst_5 {dimension_numbers = #tpu.dot_dimension_numbers<[1], [0], [0], [1], [0, 0, 1, 1], [], []>} : vector<16x16xf32>, vector<16x128xf32>, vector<16x128xf32> -> vector<16x128xf32>
    %c0_6 = arith.constant 0 : index
    %c0_7 = arith.constant 0 : index
    %c0_8 = arith.constant 0 : index
    %5 = vector.load %arg4[%c0_6, %c0_7, %c0_8] : memref<2x128x128xf32, #tpu.memory_space<vmem>>, vector<1x128x128xf32>
    %6 = vector.shape_cast %5 : vector<1x128x128xf32> to vector<128x128xf32>
    %cst_9 = arith.constant dense<0.000000e+00> : vector<16x128xf32>
    %7 = tpu.matmul %4, %6, %cst_9 {dimension_numbers = #tpu.dot_dimension_numbers<[1], [0], [0], [1], [0, 0, 1, 1], [], []>} : vector<16x128xf32>, vector<128x128xf32>, vector<16x128xf32> -> vector<16x128xf32>
    %c0_10 = arith.constant 0 : index
    %c0_11 = arith.constant 0 : index
    %c0_12 = arith.constant 0 : index
    %8 = vector.load %arg5[%c0_10, %c0_11, %c0_12] : memref<2x1x128xf32, #tpu.memory_space<vmem>>, vector<1x1x128xf32>
    %9 = vector.shape_cast %8 : vector<1x1x128xf32> to vector<1x128xf32>
    %10 = vector.broadcast %9 : vector<1x128xf32> to vector<16x128xf32>
    %11 = arith.addf %7, %10 : vector<16x128xf32>
    %c0_13 = arith.constant 0 : index
    %c0_14 = arith.constant 0 : index
    %c0_15 = arith.constant 0 : index
    %12 = vector.load %arg6[%c0_13, %c0_14, %c0_15] : memref<2x128x128xf32, #tpu.memory_space<vmem>>, vector<1x128x128xf32>
    %13 = vector.shape_cast %12 : vector<1x128x128xf32> to vector<128x128xf32>
    %cst_16 = arith.constant dense<0.000000e+00> : vector<16x128xf32>
    %14 = tpu.matmul %11, %13, %cst_16 {dimension_numbers = #tpu.dot_dimension_numbers<[1], [0], [0], [1], [0, 0, 1, 1], [], []>} : vector<16x128xf32>, vector<128x128xf32>, vector<16x128xf32> -> vector<16x128xf32>
    %c0_17 = arith.constant 0 : index
    %c0_18 = arith.constant 0 : index
    %c0_19 = arith.constant 0 : index
    %15 = vector.load %arg12[%c0_17, %c0_18, %c0_19] : memref<2x1x128xf32, #tpu.memory_space<vmem>>, vector<1x1x128xf32>
    %16 = vector.shape_cast %15 : vector<1x1x128xf32> to vector<1x128xf32>
    %17 = vector.broadcast %16 : vector<1x128xf32> to vector<16x128xf32>
    %18 = arith.addf %14, %17 : vector<16x128xf32>
    %c0_20 = arith.constant 0 : index
    %c0_21 = arith.constant 0 : index
    %c0_22 = arith.constant 0 : index
    %19 = vector.load %arg9[%c0_20, %c0_21, %c0_22] : memref<2x128x128xf32, #tpu.memory_space<vmem>>, vector<1x128x128xf32>
    %20 = vector.shape_cast %19 : vector<1x128x128xf32> to vector<128x128xf32>
    %cst_23 = arith.constant dense<0.000000e+00> : vector<16x128xf32>
    %21 = tpu.matmul %3, %20, %cst_23 {dimension_numbers = #tpu.dot_dimension_numbers<[1], [0], [0], [1], [0, 0, 1, 1], [], []>} : vector<16x128xf32>, vector<128x128xf32>, vector<16x128xf32> -> vector<16x128xf32>
    %22 = arith.addf %18, %21 : vector<16x128xf32>
    %c0_24 = arith.constant 0 : index
    %c0_25 = arith.constant 0 : index
    %c0_26 = arith.constant 0 : index
    %23 = vector.load %arg15[%c0_24, %c0_25, %c0_26] : memref<2x1x128xf32, #tpu.memory_space<vmem>>, vector<1x1x128xf32>
    %24 = vector.shape_cast %23 : vector<1x1x128xf32> to vector<1x128xf32>
    %25 = vector.broadcast %24 : vector<1x128xf32> to vector<16x128xf32>
    %26 = arith.addf %22, %25 : vector<16x128xf32>
    %27 = arith.negf %26 : vector<16x128xf32>
    %28 = math.exp %27 : vector<16x128xf32>
    %cst_27 = arith.constant 1.000000e+00 : f32
    %29 = vector.broadcast %cst_27 : f32 to vector<16x128xf32>
    %30 = arith.addf %29, %28 : vector<16x128xf32>
    %31 = arith.divf %29, %30 : vector<16x128xf32>
    %c0_28 = arith.constant 0 : index
    %c0_29 = arith.constant 0 : index
    %c0_30 = arith.constant 0 : index
    %32 = vector.load %arg7[%c0_28, %c0_29, %c0_30] : memref<2x128x128xf32, #tpu.memory_space<vmem>>, vector<1x128x128xf32>
    %33 = vector.shape_cast %32 : vector<1x128x128xf32> to vector<128x128xf32>
    %cst_31 = arith.constant dense<0.000000e+00> : vector<16x128xf32>
    %34 = tpu.matmul %11, %33, %cst_31 {dimension_numbers = #tpu.dot_dimension_numbers<[1], [0], [0], [1], [0, 0, 1, 1], [], []>} : vector<16x128xf32>, vector<128x128xf32>, vector<16x128xf32> -> vector<16x128xf32>
    %c0_32 = arith.constant 0 : index
    %c0_33 = arith.constant 0 : index
    %c0_34 = arith.constant 0 : index
    %35 = vector.load %arg13[%c0_32, %c0_33, %c0_34] : memref<2x1x128xf32, #tpu.memory_space<vmem>>, vector<1x1x128xf32>
    %36 = vector.shape_cast %35 : vector<1x1x128xf32> to vector<1x128xf32>
    %37 = vector.broadcast %36 : vector<1x128xf32> to vector<16x128xf32>
    %38 = arith.addf %34, %37 : vector<16x128xf32>
    %c0_35 = arith.constant 0 : index
    %c0_36 = arith.constant 0 : index
    %c0_37 = arith.constant 0 : index
    %39 = vector.load %arg10[%c0_35, %c0_36, %c0_37] : memref<2x128x128xf32, #tpu.memory_space<vmem>>, vector<1x128x128xf32>
    %40 = vector.shape_cast %39 : vector<1x128x128xf32> to vector<128x128xf32>
    %cst_38 = arith.constant dense<0.000000e+00> : vector<16x128xf32>
    %41 = tpu.matmul %3, %40, %cst_38 {dimension_numbers = #tpu.dot_dimension_numbers<[1], [0], [0], [1], [0, 0, 1, 1], [], []>} : vector<16x128xf32>, vector<128x128xf32>, vector<16x128xf32> -> vector<16x128xf32>
    %42 = arith.addf %38, %41 : vector<16x128xf32>
    %c0_39 = arith.constant 0 : index
    %c0_40 = arith.constant 0 : index
    %c0_41 = arith.constant 0 : index
    %43 = vector.load %arg16[%c0_39, %c0_40, %c0_41] : memref<2x1x128xf32, #tpu.memory_space<vmem>>, vector<1x1x128xf32>
    %44 = vector.shape_cast %43 : vector<1x1x128xf32> to vector<1x128xf32>
    %45 = vector.broadcast %44 : vector<1x128xf32> to vector<16x128xf32>
    %46 = arith.addf %42, %45 : vector<16x128xf32>
    %47 = arith.negf %46 : vector<16x128xf32>
    %48 = math.exp %47 : vector<16x128xf32>
    %cst_42 = arith.constant 1.000000e+00 : f32
    %49 = vector.broadcast %cst_42 : f32 to vector<16x128xf32>
    %50 = arith.addf %49, %48 : vector<16x128xf32>
    %51 = arith.divf %49, %50 : vector<16x128xf32>
    %c0_43 = arith.constant 0 : index
    %c0_44 = arith.constant 0 : index
    %c0_45 = arith.constant 0 : index
    %52 = vector.load %arg8[%c0_43, %c0_44, %c0_45] : memref<2x128x128xf32, #tpu.memory_space<vmem>>, vector<1x128x128xf32>
    %53 = vector.shape_cast %52 : vector<1x128x128xf32> to vector<128x128xf32>
    %cst_46 = arith.constant dense<0.000000e+00> : vector<16x128xf32>
    %54 = tpu.matmul %11, %53, %cst_46 {dimension_numbers = #tpu.dot_dimension_numbers<[1], [0], [0], [1], [0, 0, 1, 1], [], []>} : vector<16x128xf32>, vector<128x128xf32>, vector<16x128xf32> -> vector<16x128xf32>
    %c0_47 = arith.constant 0 : index
    %c0_48 = arith.constant 0 : index
    %c0_49 = arith.constant 0 : index
    %55 = vector.load %arg14[%c0_47, %c0_48, %c0_49] : memref<2x1x128xf32, #tpu.memory_space<vmem>>, vector<1x1x128xf32>
    %56 = vector.shape_cast %55 : vector<1x1x128xf32> to vector<1x128xf32>
    %57 = vector.broadcast %56 : vector<1x128xf32> to vector<16x128xf32>
    %58 = arith.addf %54, %57 : vector<16x128xf32>
    %c0_50 = arith.constant 0 : index
    %c0_51 = arith.constant 0 : index
    %c0_52 = arith.constant 0 : index
    %59 = vector.load %arg11[%c0_50, %c0_51, %c0_52] : memref<2x128x128xf32, #tpu.memory_space<vmem>>, vector<1x128x128xf32>
    %60 = vector.shape_cast %59 : vector<1x128x128xf32> to vector<128x128xf32>
    %cst_53 = arith.constant dense<0.000000e+00> : vector<16x128xf32>
    %61 = tpu.matmul %3, %60, %cst_53 {dimension_numbers = #tpu.dot_dimension_numbers<[1], [0], [0], [1], [0, 0, 1, 1], [], []>} : vector<16x128xf32>, vector<128x128xf32>, vector<16x128xf32> -> vector<16x128xf32>
    %c0_54 = arith.constant 0 : index
    %c0_55 = arith.constant 0 : index
    %c0_56 = arith.constant 0 : index
    %62 = vector.load %arg17[%c0_54, %c0_55, %c0_56] : memref<2x1x128xf32, #tpu.memory_space<vmem>>, vector<1x1x128xf32>
    %63 = vector.shape_cast %62 : vector<1x1x128xf32> to vector<1x128xf32>
    %64 = vector.broadcast %63 : vector<1x128xf32> to vector<16x128xf32>
    %65 = arith.addf %61, %64 : vector<16x128xf32>
    %66 = arith.mulf %31, %65 : vector<16x128xf32>
    %67 = arith.addf %58, %66 : vector<16x128xf32>
    %68 = math.tanh %67 : vector<16x128xf32>
    %cst_57 = arith.constant 1.000000e+00 : f32
    %69 = vector.broadcast %cst_57 : f32 to vector<16x128xf32>
    %70 = arith.subf %69, %51 : vector<16x128xf32>
    %71 = arith.mulf %70, %68 : vector<16x128xf32>
    %72 = arith.mulf %51, %3 : vector<16x128xf32>
    %73 = arith.addf %71, %72 : vector<16x128xf32>
    %cst_58 = arith.constant dense<0.000000e+00> : vector<16x128xf32>
    %74 = tpu.matmul %0, %73, %cst_58 {dimension_numbers = #tpu.dot_dimension_numbers<[1], [0], [0], [1], [0, 0, 1, 1], [], []>} : vector<16x16xf32>, vector<16x128xf32>, vector<16x128xf32> -> vector<16x128xf32>
    %c1 = arith.constant 1 : index
    %c0_59 = arith.constant 0 : index
    %c0_60 = arith.constant 0 : index
    %75 = vector.load %arg4[%c1, %c0_59, %c0_60] : memref<2x128x128xf32, #tpu.memory_space<vmem>>, vector<1x128x128xf32>
    %76 = vector.shape_cast %75 : vector<1x128x128xf32> to vector<128x128xf32>
    %cst_61 = arith.constant dense<0.000000e+00> : vector<16x128xf32>
    %77 = tpu.matmul %74, %76, %cst_61 {dimension_numbers = #tpu.dot_dimension_numbers<[1], [0], [0], [1], [0, 0, 1, 1], [], []>} : vector<16x128xf32>, vector<128x128xf32>, vector<16x128xf32> -> vector<16x128xf32>
    %c1_62 = arith.constant 1 : index
    %c0_63 = arith.constant 0 : index
    %c0_64 = arith.constant 0 : index
    %78 = vector.load %arg5[%c1_62, %c0_63, %c0_64] : memref<2x1x128xf32, #tpu.memory_space<vmem>>, vector<1x1x128xf32>
    %79 = vector.shape_cast %78 : vector<1x1x128xf32> to vector<1x128xf32>
    %80 = vector.broadcast %79 : vector<1x128xf32> to vector<16x128xf32>
    %81 = arith.addf %77, %80 : vector<16x128xf32>
    %c1_65 = arith.constant 1 : index
    %c0_66 = arith.constant 0 : index
    %c0_67 = arith.constant 0 : index
    %82 = vector.load %arg6[%c1_65, %c0_66, %c0_67] : memref<2x128x128xf32, #tpu.memory_space<vmem>>, vector<1x128x128xf32>
    %83 = vector.shape_cast %82 : vector<1x128x128xf32> to vector<128x128xf32>
    %cst_68 = arith.constant dense<0.000000e+00> : vector<16x128xf32>
    %84 = tpu.matmul %81, %83, %cst_68 {dimension_numbers = #tpu.dot_dimension_numbers<[1], [0], [0], [1], [0, 0, 1, 1], [], []>} : vector<16x128xf32>, vector<128x128xf32>, vector<16x128xf32> -> vector<16x128xf32>
    %c1_69 = arith.constant 1 : index
    %c0_70 = arith.constant 0 : index
    %c0_71 = arith.constant 0 : index
    %85 = vector.load %arg12[%c1_69, %c0_70, %c0_71] : memref<2x1x128xf32, #tpu.memory_space<vmem>>, vector<1x1x128xf32>
    %86 = vector.shape_cast %85 : vector<1x1x128xf32> to vector<1x128xf32>
    %87 = vector.broadcast %86 : vector<1x128xf32> to vector<16x128xf32>
    %88 = arith.addf %84, %87 : vector<16x128xf32>
    %c1_72 = arith.constant 1 : index
    %c0_73 = arith.constant 0 : index
    %c0_74 = arith.constant 0 : index
    %89 = vector.load %arg9[%c1_72, %c0_73, %c0_74] : memref<2x128x128xf32, #tpu.memory_space<vmem>>, vector<1x128x128xf32>
    %90 = vector.shape_cast %89 : vector<1x128x128xf32> to vector<128x128xf32>
    %cst_75 = arith.constant dense<0.000000e+00> : vector<16x128xf32>
    %91 = tpu.matmul %73, %90, %cst_75 {dimension_numbers = #tpu.dot_dimension_numbers<[1], [0], [0], [1], [0, 0, 1, 1], [], []>} : vector<16x128xf32>, vector<128x128xf32>, vector<16x128xf32> -> vector<16x128xf32>
    %92 = arith.addf %88, %91 : vector<16x128xf32>
    %c1_76 = arith.constant 1 : index
    %c0_77 = arith.constant 0 : index
    %c0_78 = arith.constant 0 : index
    %93 = vector.load %arg15[%c1_76, %c0_77, %c0_78] : memref<2x1x128xf32, #tpu.memory_space<vmem>>, vector<1x1x128xf32>
    %94 = vector.shape_cast %93 : vector<1x1x128xf32> to vector<1x128xf32>
    %95 = vector.broadcast %94 : vector<1x128xf32> to vector<16x128xf32>
    %96 = arith.addf %92, %95 : vector<16x128xf32>
    %97 = arith.negf %96 : vector<16x128xf32>
    %98 = math.exp %97 : vector<16x128xf32>
    %cst_79 = arith.constant 1.000000e+00 : f32
    %99 = vector.broadcast %cst_79 : f32 to vector<16x128xf32>
    %100 = arith.addf %99, %98 : vector<16x128xf32>
    %101 = arith.divf %99, %100 : vector<16x128xf32>
    %c1_80 = arith.constant 1 : index
    %c0_81 = arith.constant 0 : index
    %c0_82 = arith.constant 0 : index
    %102 = vector.load %arg7[%c1_80, %c0_81, %c0_82] : memref<2x128x128xf32, #tpu.memory_space<vmem>>, vector<1x128x128xf32>
    %103 = vector.shape_cast %102 : vector<1x128x128xf32> to vector<128x128xf32>
    %cst_83 = arith.constant dense<0.000000e+00> : vector<16x128xf32>
    %104 = tpu.matmul %81, %103, %cst_83 {dimension_numbers = #tpu.dot_dimension_numbers<[1], [0], [0], [1], [0, 0, 1, 1], [], []>} : vector<16x128xf32>, vector<128x128xf32>, vector<16x128xf32> -> vector<16x128xf32>
    %c1_84 = arith.constant 1 : index
    %c0_85 = arith.constant 0 : index
    %c0_86 = arith.constant 0 : index
    %105 = vector.load %arg13[%c1_84, %c0_85, %c0_86] : memref<2x1x128xf32, #tpu.memory_space<vmem>>, vector<1x1x128xf32>
    %106 = vector.shape_cast %105 : vector<1x1x128xf32> to vector<1x128xf32>
    %107 = vector.broadcast %106 : vector<1x128xf32> to vector<16x128xf32>
    %108 = arith.addf %104, %107 : vector<16x128xf32>
    %c1_87 = arith.constant 1 : index
    %c0_88 = arith.constant 0 : index
    %c0_89 = arith.constant 0 : index
    %109 = vector.load %arg10[%c1_87, %c0_88, %c0_89] : memref<2x128x128xf32, #tpu.memory_space<vmem>>, vector<1x128x128xf32>
    %110 = vector.shape_cast %109 : vector<1x128x128xf32> to vector<128x128xf32>
    %cst_90 = arith.constant dense<0.000000e+00> : vector<16x128xf32>
    %111 = tpu.matmul %73, %110, %cst_90 {dimension_numbers = #tpu.dot_dimension_numbers<[1], [0], [0], [1], [0, 0, 1, 1], [], []>} : vector<16x128xf32>, vector<128x128xf32>, vector<16x128xf32> -> vector<16x128xf32>
    %112 = arith.addf %108, %111 : vector<16x128xf32>
    %c1_91 = arith.constant 1 : index
    %c0_92 = arith.constant 0 : index
    %c0_93 = arith.constant 0 : index
    %113 = vector.load %arg16[%c1_91, %c0_92, %c0_93] : memref<2x1x128xf32, #tpu.memory_space<vmem>>, vector<1x1x128xf32>
    %114 = vector.shape_cast %113 : vector<1x1x128xf32> to vector<1x128xf32>
    %115 = vector.broadcast %114 : vector<1x128xf32> to vector<16x128xf32>
    %116 = arith.addf %112, %115 : vector<16x128xf32>
    %117 = arith.negf %116 : vector<16x128xf32>
    %118 = math.exp %117 : vector<16x128xf32>
    %cst_94 = arith.constant 1.000000e+00 : f32
    %119 = vector.broadcast %cst_94 : f32 to vector<16x128xf32>
    %120 = arith.addf %119, %118 : vector<16x128xf32>
    %121 = arith.divf %119, %120 : vector<16x128xf32>
    %c1_95 = arith.constant 1 : index
    %c0_96 = arith.constant 0 : index
    %c0_97 = arith.constant 0 : index
    %122 = vector.load %arg8[%c1_95, %c0_96, %c0_97] : memref<2x128x128xf32, #tpu.memory_space<vmem>>, vector<1x128x128xf32>
    %123 = vector.shape_cast %122 : vector<1x128x128xf32> to vector<128x128xf32>
    %cst_98 = arith.constant dense<0.000000e+00> : vector<16x128xf32>
    %124 = tpu.matmul %81, %123, %cst_98 {dimension_numbers = #tpu.dot_dimension_numbers<[1], [0], [0], [1], [0, 0, 1, 1], [], []>} : vector<16x128xf32>, vector<128x128xf32>, vector<16x128xf32> -> vector<16x128xf32>
    %c1_99 = arith.constant 1 : index
    %c0_100 = arith.constant 0 : index
    %c0_101 = arith.constant 0 : index
    %125 = vector.load %arg14[%c1_99, %c0_100, %c0_101] : memref<2x1x128xf32, #tpu.memory_space<vmem>>, vector<1x1x128xf32>
    %126 = vector.shape_cast %125 : vector<1x1x128xf32> to vector<1x128xf32>
    %127 = vector.broadcast %126 : vector<1x128xf32> to vector<16x128xf32>
    %128 = arith.addf %124, %127 : vector<16x128xf32>
    %c1_102 = arith.constant 1 : index
    %c0_103 = arith.constant 0 : index
    %c0_104 = arith.constant 0 : index
    %129 = vector.load %arg11[%c1_102, %c0_103, %c0_104] : memref<2x128x128xf32, #tpu.memory_space<vmem>>, vector<1x128x128xf32>
    %130 = vector.shape_cast %129 : vector<1x128x128xf32> to vector<128x128xf32>
    %cst_105 = arith.constant dense<0.000000e+00> : vector<16x128xf32>
    %131 = tpu.matmul %73, %130, %cst_105 {dimension_numbers = #tpu.dot_dimension_numbers<[1], [0], [0], [1], [0, 0, 1, 1], [], []>} : vector<16x128xf32>, vector<128x128xf32>, vector<16x128xf32> -> vector<16x128xf32>
    %c1_106 = arith.constant 1 : index
    %c0_107 = arith.constant 0 : index
    %c0_108 = arith.constant 0 : index
    %132 = vector.load %arg17[%c1_106, %c0_107, %c0_108] : memref<2x1x128xf32, #tpu.memory_space<vmem>>, vector<1x1x128xf32>
    %133 = vector.shape_cast %132 : vector<1x1x128xf32> to vector<1x128xf32>
    %134 = vector.broadcast %133 : vector<1x128xf32> to vector<16x128xf32>
    %135 = arith.addf %131, %134 : vector<16x128xf32>
    %136 = arith.mulf %101, %135 : vector<16x128xf32>
    %137 = arith.addf %128, %136 : vector<16x128xf32>
    %138 = math.tanh %137 : vector<16x128xf32>
    %cst_109 = arith.constant 1.000000e+00 : f32
    %139 = vector.broadcast %cst_109 : f32 to vector<16x128xf32>
    %140 = arith.subf %139, %121 : vector<16x128xf32>
    %141 = arith.mulf %140, %138 : vector<16x128xf32>
    %142 = arith.mulf %121, %73 : vector<16x128xf32>
    %143 = arith.addf %141, %142 : vector<16x128xf32>
    %c0_110 = arith.constant 0 : index
    %c0_111 = arith.constant 0 : index
    %144 = vector.load %arg18[%c0_110, %c0_111] : memref<16x128xf32, #tpu.memory_space<vmem>>, vector<16x128xf32>
    tpu.vector_store %arg18[%c0_110, %c0_111], %143 {strides = array<i32>} : memref<16x128xf32, #tpu.memory_space<vmem>>, vector<16x128xf32>,
    return
  }
  func.func @transform_0(%arg0: i32) -> (i32, i32) {
    %c0_i32 = arith.constant 0 : i32
    %c0_i32_0 = arith.constant 0 : i32
    %c0_i32_1 = arith.constant 0 : i32
    return %c0_i32, %c0_i32_0 : i32, i32
  }
  func.func @transform_1(%arg0: i32) -> (i32, i32) {
    %c0_i32 = arith.constant 0 : i32
    %c0_i32_0 = arith.constant 0 : i32
    %c0_i32_1 = arith.constant 0 : i32
    return %c0_i32, %c0_i32_0 : i32, i32
  }
  func.func @transform_2(%arg0: i32) -> (i32, i32) {
    %c0_i32 = arith.constant 0 : i32
    %c0_i32_0 = arith.constant 0 : i32
    %c0_i32_1 = arith.constant 0 : i32
    return %c0_i32, %c0_i32_0 : i32, i32
  }
  func.func @transform_3(%arg0: i32) -> (i32, i32, i32) {
    %c0_i32 = arith.constant 0 : i32
    %c0_i32_0 = arith.constant 0 : i32
    %c0_i32_1 = arith.constant 0 : i32
    %c0_i32_2 = arith.constant 0 : i32
    return %c0_i32, %c0_i32_0, %c0_i32_1 : i32, i32, i32
  }
  func.func @transform_4(%arg0: i32) -> (i32, i32, i32) {
    %c0_i32 = arith.constant 0 : i32
    %c0_i32_0 = arith.constant 0 : i32
    %c0_i32_1 = arith.constant 0 : i32
    %c0_i32_2 = arith.constant 0 : i32
    return %c0_i32, %c0_i32_0, %c0_i32_1 : i32, i32, i32
  }
  func.func @transform_5(%arg0: i32) -> (i32, i32, i32) {
    %c0_i32 = arith.constant 0 : i32
    %c0_i32_0 = arith.constant 0 : i32
    %c0_i32_1 = arith.constant 0 : i32
    %c0_i32_2 = arith.constant 0 : i32
    return %c0_i32, %c0_i32_0, %c0_i32_1 : i32, i32, i32
  }
  func.func @transform_6(%arg0: i32) -> (i32, i32, i32) {
    %c0_i32 = arith.constant 0 : i32
    %c0_i32_0 = arith.constant 0 : i32
    %c0_i32_1 = arith.constant 0 : i32
    %c0_i32_2 = arith.constant 0 : i32
    return %c0_i32, %c0_i32_0, %c0_i32_1 : i32, i32, i32
  }
  func.func @transform_7(%arg0: i32) -> (i32, i32, i32) {
    %c0_i32 = arith.constant 0 : i32
    %c0_i32_0 = arith.constant 0 : i32
    %c0_i32_1 = arith.constant 0 : i32
    %c0_i32_2 = arith.constant 0 : i32
    return %c0_i32, %c0_i32_0, %c0_i32_1 : i32, i32, i32
  }
  func.func @transform_8(%arg0: i32) -> (i32, i32, i32) {
    %c0_i32 = arith.constant 0 : i32
    %c0_i32_0 = arith.constant 0 : i32
    %c0_i32_1 = arith.constant 0 : i32
    %c0_i32_2 = arith.constant 0 : i32
    return %c0_i32, %c0_i32_0, %c0_i32_1 : i32, i32, i32
  }
  func.func @transform_9(%arg0: i32) -> (i32, i32, i32) {
    %c0_i32 = arith.constant 0 : i32
    %c0_i32_0 = arith.constant 0 : i32
    %c0_i32_1 = arith.constant 0 : i32
    %c0_i32_2 = arith.constant 0 : i32
    return %c0_i32, %c0_i32_0, %c0_i32_1 : i32, i32, i32
  }
  func.func @transform_10(%arg0: i32) -> (i32, i32, i32) {
    %c0_i32 = arith.constant 0 : i32
    %c0_i32_0 = arith.constant 0 : i32
    %c0_i32_1 = arith.constant 0 : i32
    %c0_i32_2 = arith.constant 0 : i32
    return %c0_i32, %c0_i32_0, %c0_i32_1 : i32, i32, i32
  }
  func.func @transform_11(%arg0: i32) -> (i32, i32, i32) {
    %c0_i32 = arith.constant 0 : i32
    %c0_i32_0 = arith.constant 0 : i32
    %c0_i32_1 = arith.constant 0 : i32
    %c0_i32_2 = arith.constant 0 : i32
    return %c0_i32, %c0_i32_0, %c0_i32_1 : i32, i32, i32
  }
  func.func @transform_12(%arg0: i32) -> (i32, i32, i32) {
    %c0_i32 = arith.constant 0 : i32
    %c0_i32_0 = arith.constant 0 : i32
    %c0_i32_1 = arith.constant 0 : i32
    %c0_i32_2 = arith.constant 0 : i32
    return %c0_i32, %c0_i32_0, %c0_i32_1 : i32, i32, i32
  }
  func.func @transform_13(%arg0: i32) -> (i32, i32, i32) {
    %c0_i32 = arith.constant 0 : i32
    %c0_i32_0 = arith.constant 0 : i32
    %c0_i32_1 = arith.constant 0 : i32
    %c0_i32_2 = arith.constant 0 : i32
    return %c0_i32, %c0_i32_0, %c0_i32_1 : i32, i32, i32
  }
  func.func @transform_14(%arg0: i32) -> (i32, i32, i32) {
    %c0_i32 = arith.constant 0 : i32
    %c0_i32_0 = arith.constant 0 : i32
    %c0_i32_1 = arith.constant 0 : i32
    %c0_i32_2 = arith.constant 0 : i32
    return %c0_i32, %c0_i32_0, %c0_i32_1 : i32, i32, i32
  }
  func.func @transform_15(%arg0: i32) -> (i32, i32, i32) {
    %c0_i32 = arith.constant 0 : i32
    %c0_i32_0 = arith.constant 0 : i32
    %c0_i32_1 = arith.constant 0 : i32
    %c0_i32_2 = arith.constant 0 : i32
    return %c0_i32, %c0_i32_0, %c0_i32_1 : i32, i32, i32
  }
  func.func @transform_16(%arg0: i32) -> (i32, i32, i32) {
    %c0_i32 = arith.constant 0 : i32
    %c0_i32_0 = arith.constant 0 : i32
    %c0_i32_1 = arith.constant 0 : i32
    %c0_i32_2 = arith.constant 0 : i32
    return %c0_i32, %c0_i32_0, %c0_i32_1 : i32, i32, i32
  }
  func.func @transform_17(%arg0: i32) -> (i32, i32) {
    %c0_i32 = arith.constant 0 : i32
    %c0_i32_0 = arith.constant 0 : i32
    %c0_i32_1 = arith.constant 0 : i32
    return %c0_i32, %c0_i32_0 : i32, i32
  }
}

</mosaic_0001>

<bundles_post_ra>
// kernel: tpu_custom_call.1
= control target key start
LH: loop header
LB: loop body
LE: loop exit
PB: predicated region body
PF: predicated region fallthrough
CT: control target
= control target key end

     0   :  { %s1830_s0 = inlined_call_operand.hbm [shape: f32[16,16], index: 0, kind: input, shape index: {}]   ;;  %s1831_s1 = inlined_call_operand.hbm [shape: f32[16,128], index: 1, kind: input, shape index: {}]   ;;  %s1832_s2 = inlined_call_operand.hbm [shape: f32[128,128], index: 2, kind: input, shape index: {}]   ;;  %s1833_s3 = inlined_call_operand.hbm [shape: f32[2,128,128], index: 3, kind: input, shape index: {}]   ;;  %s1834_s4 = inlined_call_operand.vmem [shape: f32[2,1,128], index: 4, kind: input, shape index: {}]   ;;  %s1835_s5 = inlined_call_operand.hbm [shape: f32[2,128,128], index: 5, kind: input, shape index: {}]   ;;  %s1836_s6 = inlined_call_operand.hbm [shape: f32[2,128,128], index: 6, kind: input, shape index: {}]   ;;  %s1837_s7 = inlined_call_operand.hbm [shape: f32[2,128,128], index: 7, kind: input, shape index: {}]   ;;  %s1838_s8 = inlined_call_operand.hbm [shape: f32[2,128,128], index: 8, kind: input, shape index: {}]   ;;  %s1839_s9 = inlined_call_operand.hbm [shape: f32[2,128,128], index: 9, kind: input, shape index: {}]   ;;  %s1840_s10 = inlined_call_operand.hbm [shape: f32[2,128,128], index: 10, kind: input, shape index: {}]   ;;  %s1841_s11 = inlined_call_operand.vmem [shape: f32[2,1,128], index: 11, kind: input, shape index: {}]   ;;  %s1842_s12 = inlined_call_operand.vmem [shape: f32[2,1,128], index: 12, kind: input, shape index: {}]   ;;  %s1843_s13 = inlined_call_operand.vmem [shape: f32[2,1,128], index: 13, kind: input, shape index: {}]   ;;  %s1844_s14 = inlined_call_operand.vmem [shape: f32[2,1,128], index: 14, kind: input, shape index: {}]   ;;  %s1845_s15 = inlined_call_operand.vmem [shape: f32[2,1,128], index: 15, kind: input, shape index: {}]   ;;  %s1846_s16 = inlined_call_operand.vmem [shape: f32[2,1,128], index: 16, kind: input, shape index: {}]   ;;  %s1847_s17 = inlined_call_operand.hbm [shape: f32[16,128], index: 17, kind: output, shape index: {}]  }
   0x1   :  { %1848 = sst [smem:[#allocation27_spill]] %s1830_s0 }
   0x2   :  { %1849 = sst [smem:[#allocation28_spill]] %s1831_s1 }
   0x3   :  { %22 = vsyncpa [#allocation3], 0 }
   0x4   :  { %23 = vsyncpa [#allocation6], 0 }
   0x5   :  { %24 = vsyncpa [#allocation9], 0 }
   0x6   :  { %25 = vsyncpa [#allocation12], 0 }
   0x7   :  { %26 = vsyncpa [#allocation15], 0 }
   0x8   :  { %27 = vsyncpa [#allocation18], 0 }
   0x9   :  { %28 = vsyncpa [#allocation4], 0  ;;  %s1850_s26 = sld [smem:[#allocation28_spill]]  ;;  %s1511_s28 = smov [#allocation5]  }
   0xa   :  { %s48_s29 = sshll.u32 %s1511_s28, 4  ;;  %s72_s18 = sshll.u32 %s1833_s3, 4  ;;  %s49_s29 = int_to_ptr.vmem [resolvable:$true] %s48_s29  ;;  %s73_s18 = int_to_ptr.hbm [resolvable:$true] %s72_s18 }
   0xb   :  { %s1512_s19 = smov 128   ;;  %s1513_s1 = smov 8  }
   0xc   :  { %s1514_s20 = smov [#allocation8]   ;;  %s100_s24 = sshll.u32 %s1836_s6, 4  ;;  %s101_s24 = int_to_ptr.hbm [resolvable:$true] %s100_s24 }
   0xd   :  { %s74_s21 = sshll.u32 %s1514_s20, 4  ;;  %s1515_s28 = smov [#allocation11]   ;;  %s75_s21 = int_to_ptr.vmem [resolvable:$true] %s74_s21 }
   0xe   :  { %80 = dma.hbm_to_vmem [thread:$0]  %s73_s18, 4096, %s75_s21, [#allocation9], %s1512_s19, %s1512_s19, %s1513_s1  }
   0xf   :  { %s46_s27 = sshll.u32 %s1850_s26, 4  ;;  %s126_s26 = sshll.u32 %s1838_s8, 4  ;;  %s47_s27 = int_to_ptr.hbm [resolvable:$true] %s46_s27  ;;  %s127_s26 = int_to_ptr.hbm [resolvable:$true] %s126_s26 }
  0x10   :  { %54 = dma.hbm_to_vmem [thread:$0]  %s47_s27, 256, %s49_s29, [#allocation6], %s1512_s19, %s1512_s19, %s1513_s1  }
  0x11   :  { %s102_s0 = sshll.u32 %s1515_s28, 4  ;;  %s1516_s27 = smov [#allocation14]   ;;  %s103_s0 = int_to_ptr.vmem [resolvable:$true] %s102_s0 }
  0x12   :  { %108 = dma.hbm_to_vmem [thread:$0]  %s101_s24, 4096, %s103_s0, [#allocation12], %s1512_s19, %s1512_s19, %s1513_s1  }
  0x13   :  { %s128_s6 = sshll.u32 %s1516_s27, 4  ;;  %s1851_s20 = sld [smem:[#allocation27_spill]]  ;;  %s129_s6 = int_to_ptr.vmem [resolvable:$true] %s128_s6 }
  0x14   :  { %134 = dma.hbm_to_vmem [thread:$0]  %s127_s26, 4096, %s129_s6, [#allocation15], %s1512_s19, %s1512_s19, %s1513_s1  }
  0x15   :  { %s59_s21 = sshll.u32 %s1832_s2, 4  ;;  %s1517_s23 = smov [#allocation2]   ;;  %s60_s21 = int_to_ptr.hbm [resolvable:$true] %s59_s21 }
  0x16   :  { %s35_s3 = sshll.u32 %s1517_s23, 4  ;;  %s1518_s24 = smov [#allocation7]   ;;  %s36_s3 = int_to_ptr.vmem [resolvable:$true] %s35_s3 }
  0x17   :  { %s61_s25 = sshll.u32 %s1518_s24, 4  ;;  %s87_s27 = sshll.u32 %s1835_s5, 4  ;;  %s62_s25 = int_to_ptr.vmem [resolvable:$true] %s61_s25  ;;  %s88_s27 = int_to_ptr.hbm [resolvable:$true] %s87_s27 }
  0x18   :  { %67 = dma.hbm_to_vmem [thread:$0]  %s60_s21, 2048, %s62_s25, [#allocation6], %s1512_s19, %s1512_s19, %s1513_s1  }
  0x19   :  { %s33_s22 = sshll.u32 %s1851_s20, 4  ;;  %s113_s6 = sshll.u32 %s1837_s7, 4  ;;  %s34_s22 = int_to_ptr.hbm [resolvable:$true] %s33_s22  ;;  %s114_s6 = int_to_ptr.hbm [resolvable:$true] %s113_s6 }
  0x1a   :  { %41 = dma.hbm_to_vmem [thread:$0]  %s34_s22, 256, %s36_s3, [#allocation3], %s1512_s19, %s1512_s19, %s1513_s1  }
  0x1b   :  { %s1519_s29 = smov [#allocation10]   ;;  %s1520_s20 = smov [#allocation13]  }
  0x1c   :  { %s89_s30 = sshll.u32 %s1519_s29, 4  ;;  %s115_s5 = sshll.u32 %s1520_s20, 4  ;;  %s90_s30 = int_to_ptr.vmem [resolvable:$true] %s89_s30  ;;  %s116_s5 = int_to_ptr.vmem [resolvable:$true] %s115_s5 }
  0x1d   :  { %95 = dma.hbm_to_vmem [thread:$0]  %s88_s27, 4096, %s90_s30, [#allocation9], %s1512_s19, %s1512_s19, %s1513_s1  }
  0x1e   :  { %s139_s18 = sshll.u32 %s1839_s9, 4  ;;  %s152_s23 = sshll.u32 %s1840_s10, 4  ;;  %s140_s18 = int_to_ptr.hbm [resolvable:$true] %s139_s18  ;;  %s153_s23 = int_to_ptr.hbm [resolvable:$true] %s152_s23 }
  0x1f   :  { %121 = dma.hbm_to_vmem [thread:$0]  %s114_s6, 4096, %s116_s5, [#allocation12], %s1512_s19, %s1512_s19, %s1513_s1  }
  0x20   :  { %s1521_s3 = smov [#allocation16]   ;;  %s1522_s25 = smov [#allocation17]  }
  0x21   :  { %s141_s24 = sshll.u32 %s1521_s3, 4  ;;  %s154_s9 = sshll.u32 %s1522_s25, 4  ;;  %s142_s24 = int_to_ptr.vmem [resolvable:$true] %s141_s24  ;;  %s155_s9 = int_to_ptr.vmem [resolvable:$true] %s154_s9 }
  0x22   :  { %147 = dma.hbm_to_vmem [thread:$0]  %s140_s18, 4096, %s142_s24, [#allocation15], %s1512_s19, %s1512_s19, %s1513_s1  }
  0x23   :  { %160 = dma.hbm_to_vmem [thread:$0]  %s153_s23, 4096, %s155_s9, [#allocation18], %s1512_s19, %s1512_s19, %s1513_s1  }
  0x24   :  { %1497 = dma.done.wait [#allocation3], 256  }
  0x25   :  { %1498 = vsyncadd [#allocation3], 4294967040 }
  0x26   :  { %1499 = dma.done.wait [#allocation6], 2304  }
  0x27   :  { %1500 = vsyncadd [#allocation6], 4294964992 }
  0x28   :  { %1501 = dma.done.wait [#allocation9], 8192  }
  0x29   :  { %1502 = vsyncadd [#allocation9], 4294959104 }
  0x2a   :  { %1503 = dma.done.wait [#allocation12], 8192  }
  0x2b   :  { %1504 = vsyncadd [#allocation12], 4294959104 }
  0x2c   :  { %1505 = dma.done.wait [#allocation15], 8192  }
  0x2d   :  { %1506 = vsyncadd [#allocation15], 4294959104 }
  0x2e   :  { %1507 = dma.done.wait [#allocation18], 4096  }
  0x2f   :  { %1508 = vsyncadd [#allocation18], 4294963200  ;;  %v232_v0 = vld [vmem:[#allocation7 + $0x78] sm:$0xff]  ;;  %v231_v1 = vld [vmem:[#allocation7 + $0x70] sm:$0xff]  ;;  %vm256_vm0 = vcmask 130048   ;;  %s1129_s2 = sshll.u32 %s1847_s17, 4  ;;  %s1130_s2 = int_to_ptr.hbm [resolvable:$true] %s1129_s2 }
  0x30   :  { %233 = vmatpush.msra.mxu0 %v232_v0  ;;  %v230_v2 = vld [vmem:[#allocation7 + $0x68] sm:$0xff]  ;;  %v229_v3 = vld [vmem:[#allocation7 + $0x60] sm:$0xff]  ;;  %v228_v4 = vld [vmem:[#allocation7 + $0x58] sm:$0xff] }
  0x31   :  { %v227_v5 = vld [vmem:[#allocation7 + $0x50] sm:$0xff]  ;;  %v387_v6 = vld [vmem:[#allocation14 + $0x78] sm:$0xff]  ;;  %v226_v8 = vld [vmem:[#allocation7 + $0x48] sm:$0xff] }
  0x32   :  { %234 = vmatpush.msra.mxu0 %v231_v1  ;;  %v386_v7 = vld [vmem:[#allocation14 + $0x70] sm:$0xff]  ;;  %388 = vmatpush.msra.mxu1 %v387_v6  ;;  %v385_v9 = vld [vmem:[#allocation14 + $0x68] sm:$0xff]  ;;  %v225_v10 = vld [vmem:[#allocation7 + $0x40] sm:$0xff] }
  0x33   :  { %v384_v11 = vld [vmem:[#allocation14 + $0x60] sm:$0xff]  ;;  %v224_v12 = vld [vmem:[#allocation7 + $0x38] sm:$0xff]  ;;  %v223_v13 = vld [vmem:[#allocation7 + $0x30] sm:$0xff] }
  0x34   :  { %235 = vmatpush.msra.mxu0 %v230_v2  ;;  %389 = vmatpush.msra.mxu1 %v386_v7  ;;  %v383_v14 = vld [vmem:[#allocation14 + $0x58] sm:$0xff]  ;;  %v382_v15 = vld [vmem:[#allocation14 + $0x50] sm:$0xff]  ;;  %v222_v16 = vld [vmem:[#allocation7 + $0x28] sm:$0xff] }
  0x35   :  { %v381_v17 = vld [vmem:[#allocation14 + $0x48] sm:$0xff]  ;;  %v221_v18 = vld [vmem:[#allocation7 + $0x20] sm:$0xff]  ;;  %v220_v20 = vld [vmem:[#allocation7 + $0x18] sm:$0xff] }
  0x36   :  { %236 = vmatpush.msra.mxu0 %v229_v3  ;;  %390 = vmatpush.msra.mxu1 %v385_v9  ;;  %v380_v19 = vld [vmem:[#allocation14 + $0x40] sm:$0xff]  ;;  %v379_v21 = vld [vmem:[#allocation14 + $0x38] sm:$0xff]  ;;  %v219_v22 = vld [vmem:[#allocation7 + $0x10] sm:$0xff] }
  0x37   :  { %v378_v23 = vld [vmem:[#allocation14 + $0x30] sm:$0xff]  ;;  %v218_v24 = vld [vmem:[#allocation7 + $0x8] sm:$0xff]  ;;  %v217_v26 = vld [vmem:[#allocation7] sm:$0xff] }
  0x38   :  { %237 = vmatpush.msra.mxu0 %v228_v4  ;;  %391 = vmatpush.msra.mxu1 %v384_v11  ;;  %v377_v25 = vld [vmem:[#allocation14 + $0x28] sm:$0xff]  ;;  %v376_v27 = vld [vmem:[#allocation14 + $0x20] sm:$0xff]  ;;  %v215_v28 = vld [vmem:[#allocation5] sm:$0xff] }
  0x39   :  { %v375_v29 = vld [vmem:[#allocation14 + $0x18] sm:$0xff]  ;;  %v374_v30 = vld [vmem:[#allocation14 + $0x10] sm:$0xff]  ;;  %v373_v31 = vld [vmem:[#allocation14 + $0x8] sm:$0xff] }
  0x3a   :  { %238 = vmatpush.msra.mxu0 %v227_v5  ;;  %392 = vmatpush.msra.mxu1 %v383_v14  ;;  %v372_v32 = vld [vmem:[#allocation14] sm:$0xff]  ;;  %v216_v33 = vld [vmem:[#allocation5 + $0x8] sm:$0xff]  ;;  %v642_v35 = vld [vmem:[#allocation17 + $0x70] sm:$0xff] }
  0x3b   :  { %v643_v34 = vld [vmem:[#allocation17 + $0x78] sm:$0xff]  ;;  %v641_v36 = vld [vmem:[#allocation17 + $0x68] sm:$0xff]  ;;  %v640_v37 = vld [vmem:[#allocation17 + $0x60] sm:$0xff] }
  0x3c   :  { %239 = vmatpush.msra.mxu0 %v226_v8  ;;  %393 = vmatpush.msra.mxu1 %v382_v15  ;;  %v639_v38 = vld [vmem:[#allocation17 + $0x58] sm:$0xff]  ;;  %v638_v39 = vld [vmem:[#allocation17 + $0x50] sm:$0xff]  ;;  %v637_v40 = vld [vmem:[#allocation17 + $0x48] sm:$0xff] }
  0x3d   :  { %v636_v41 = vld [vmem:[#allocation17 + $0x40] sm:$0xff]  ;;  %v635_v42 = vld [vmem:[#allocation17 + $0x38] sm:$0xff]  ;;  %v634_v43 = vld [vmem:[#allocation17 + $0x30] sm:$0xff] }
  0x3e   :  { %240 = vmatpush.msra.mxu0 %v225_v10  ;;  %394 = vmatpush.msra.mxu1 %v381_v17  ;;  %v633_v44 = vld [vmem:[#allocation17 + $0x28] sm:$0xff]  ;;  %v632_v45 = vld [vmem:[#allocation17 + $0x20] sm:$0xff]  ;;  %v631_v46 = vld [vmem:[#allocation17 + $0x18] sm:$0xff] }
  0x3f   :  { %v630_v47 = vld [vmem:[#allocation17 + $0x10] sm:$0xff]  ;;  %v629_v48 = vld [vmem:[#allocation17 + $0x8] sm:$0xff]  ;;  %v628_v49 = vld [vmem:[#allocation17] sm:$0xff] }
  0x40   :  { %241 = vmatpush.msra.mxu0 %v224_v12  ;;  %395 = vmatpush.msra.mxu1 %v380_v19  ;;  %v301_v50 = vld [vmem:[#allocation8 + $0x78] sm:$0xff]  ;;  %v300_v51 = vld [vmem:[#allocation8 + $0x70] sm:$0xff]  ;;  %v299_v52 = vld [vmem:[#allocation8 + $0x68] sm:$0xff] }
  0x41   :  { %306 = vmatpush.msra.mxu2 %v301_v50  ;;  %v298_v53 = vld [vmem:[#allocation8 + $0x60] sm:$0xff]  ;;  %v297_v54 = vld [vmem:[#allocation8 + $0x58] sm:$0xff]  ;;  %v296_v56 = vld [vmem:[#allocation8 + $0x50] sm:$0xff] }
  0x42   :  { %242 = vmatpush.msra.mxu0 %v223_v13  ;;  %396 = vmatpush.msra.mxu1 %v379_v21  ;;  %v295_v57 = vld [vmem:[#allocation8 + $0x48] sm:$0xff]  ;;  %v294_v58 = vld [vmem:[#allocation8 + $0x40] sm:$0xff]  ;;  %v293_v59 = vld [vmem:[#allocation8 + $0x38] sm:$0xff] }
  0x43   :  { %307 = vmatpush.msra.mxu2 %v300_v51  ;;  %v1681_v61 = vld [vmem:[#allocation2] sm:$0xff]  ;;  %v292_v62 = vld [vmem:[#allocation8 + $0x30] sm:$0xff]  ;;  %v291_v63 = vld [vmem:[#allocation8 + $0x28] sm:$0xff] }
  0x44   :  { %243 = vmatpush.msra.mxu0 %v222_v16  ;;  %397 = vmatpush.msra.mxu1 %v378_v23  ;;  %v290_v0 = vld [vmem:[#allocation8 + $0x20] sm:$0xff]  ;;  %v289_v1 = vld [vmem:[#allocation8 + $0x18] sm:$0xff]  ;;  %v1687_v2 = vld [vmem:[#allocation2 + $0x8] sm:$0xff] }
  0x45   :  { %308 = vmatpush.msra.mxu2 %v299_v52  ;;  %v288_v3 = vld [vmem:[#allocation8 + $0x10] sm:$0xff]  ;;  %v287_v4 = vld [vmem:[#allocation8 + $0x8] sm:$0xff]  ;;  %v286_v5 = vld [vmem:[#allocation8] sm:$0xff] }
  0x46   :  { %244 = vmatpush.msra.mxu0 %v221_v18  ;;  %398 = vmatpush.msra.mxu1 %v377_v25  ;;  %v515_v6 = vld [vmem:[#allocation16 + $0x78] sm:$0xff]  ;;  %v514_v7 = vld [vmem:[#allocation16 + $0x70] sm:$0xff]  ;;  %v513_v8 = vld [vmem:[#allocation16 + $0x68] sm:$0xff] }
  0x47   :  { %309 = vmatpush.msra.mxu2 %v298_v53  ;;  %v512_v9 = vld [vmem:[#allocation16 + $0x60] sm:$0xff]  ;;  %v511_v10 = vld [vmem:[#allocation16 + $0x58] sm:$0xff]  ;;  %v510_v11 = vld [vmem:[#allocation16 + $0x50] sm:$0xff] }
  0x48   :  { %245 = vmatpush.msra.mxu0 %v220_v20  ;;  %399 = vmatpush.msra.mxu1 %v376_v27  ;;  %v509_v12 = vld [vmem:[#allocation16 + $0x48] sm:$0xff]  ;;  %v508_v13 = vld [vmem:[#allocation16 + $0x40] sm:$0xff]  ;;  %v507_v14 = vld [vmem:[#allocation16 + $0x38] sm:$0xff] }
  0x49   :  { %310 = vmatpush.msra.mxu2 %v297_v54  ;;  %v506_v15 = vld [vmem:[#allocation16 + $0x30] sm:$0xff]  ;;  %v505_v16 = vld [vmem:[#allocation16 + $0x28] sm:$0xff]  ;;  %v504_v17 = vld [vmem:[#allocation16 + $0x20] sm:$0xff] }
  0x4a   :  { %246 = vmatpush.msra.mxu0 %v219_v22  ;;  %400 = vmatpush.msra.mxu1 %v375_v29  ;;  %v503_v18 = vld [vmem:[#allocation16 + $0x18] sm:$0xff]  ;;  %v502_v19 = vld [vmem:[#allocation16 + $0x10] sm:$0xff]  ;;  %v501_v20 = vld [vmem:[#allocation16 + $0x8] sm:$0xff] }
  0x4b   :  { %311 = vmatpush.msra.mxu2 %v296_v56  ;;  %v500_v21 = vld [vmem:[#allocation16] sm:$0xff]  ;;  %v344_v22 = vld [vmem:[#allocation10 + $0x78] sm:$0xff]  ;;  %v343_v23 = vld [vmem:[#allocation10 + $0x70] sm:$0xff] }
  0x4c   :  { %247 = vmatpush.msra.mxu0 %v218_v24  ;;  %401 = vmatpush.msra.mxu1 %v374_v30  ;;  %v342_v24 = vld [vmem:[#allocation10 + $0x68] sm:$0xff]  ;;  %v472_v25 = vld [vmem:[#allocation11 + $0x78] sm:$0xff]  ;;  %v341_v27 = vld [vmem:[#allocation10 + $0x60] sm:$0xff] }
  0x4d   :  { %312 = vmatpush.msra.mxu2 %v295_v57  ;;  %349 = vmatpush.msra.mxu3 %v344_v22  ;;  %v340_v29 = vld [vmem:[#allocation10 + $0x58] sm:$0xff]  ;;  %v469_v30 = vld [vmem:[#allocation11 + $0x60] sm:$0xff]  ;;  %v330_v51 = vld [vmem:[#allocation10 + $0x8] sm:$0xff] }
  0x4e   :  { %248 = vmatpush.msra.mxu0 %v217_v26  ;;  %402 = vmatpush.msra.mxu1 %v373_v31  ;;  %v471_v26 = vld [vmem:[#allocation11 + $0x70] sm:$0xff]  ;;  %v460_v50 = vld [vmem:[#allocation11 + $0x18] sm:$0xff]  ;;  %v329_v53 = vld [vmem:[#allocation10] sm:$0xff] }
  0x4f   :  { %249 = vmatmul.f32.vlgmr.msra.gmra.mxu0 %v215_v28  ;;  %313 = vmatpush.msra.mxu2 %v294_v58  ;;  %v470_v28 = vld [vmem:[#allocation11 + $0x68] sm:$0xff]  ;;  %v459_v52 = vld [vmem:[#allocation11 + $0x10] sm:$0xff]  ;;  %v600_v54 = vld [vmem:[#allocation13 + $0x78] sm:$0xff] }
  0x50   :  { %403 = vmatpush.msra.mxu1 %v372_v32  ;;  %350 = vmatpush.msra.mxu3 %v343_v23  ;;  %v339_v32 = vld [vmem:[#allocation10 + $0x50] sm:$0xff]  ;;  %v598_v57 = vld [vmem:[#allocation13 + $0x68] sm:$0xff]  ;;  %v597_v58 = vld [vmem:[#allocation13 + $0x60] sm:$0xff] }
  0x51   :  { %314 = vmatpush.msra.mxu2 %v293_v59  ;;  %v599_v56 = vld [vmem:[#allocation13 + $0x70] sm:$0xff]  ;;  %v596_v59 = vld [vmem:[#allocation13 + $0x58] sm:$0xff]  ;;  %v808_v23 = vld [vmem:[#allocation14 + $0xc8] sm:$0xff] }
  0x52   :  { %648 = vmatpush.msrb.mxu1 %v643_v34  ;;  %351 = vmatpush.msra.mxu3 %v342_v24  ;;  %v338_v34 = vld [vmem:[#allocation10 + $0x48] sm:$0xff]  ;;  %v809_v22 = vld [vmem:[#allocation14 + $0xd0] sm:$0xff]  ;;  %v807_v24 = vld [vmem:[#allocation14 + $0xc0] sm:$0xff] }
  0x53   :  { %315 = vmatpush.msra.mxu2 %v292_v62  ;;  %v595_v62 = vld [vmem:[#allocation13 + $0x50] sm:$0xff] }
  0x54   :  { %649 = vmatpush.msrb.mxu1 %v642_v35  ;;  %352 = vmatpush.msra.mxu3 %v341_v27  ;;  %v467_v35 = vld [vmem:[#allocation11 + $0x50] sm:$0xff]  ;;  %v1181_v27 = vld [vmem:[%s1842_s12] ss:$0 sm:$0xff] }
  0x55   :  { %316 = vmatpush.msra.mxu2 %v291_v63  ;;  %v458_v63 = vld [vmem:[#allocation11 + $0x8] sm:$0xff] }
  0x56   :  { %650 = vmatpush.msrb.mxu1 %v641_v36  ;;  %353 = vmatpush.msra.mxu3 %v340_v29  ;;  %v337_v36 = vld [vmem:[#allocation10 + $0x40] sm:$0xff] }
  0x57   :  { %252 = vmatmul.f32.gmra.mxu0 %v216_v33  ;;  %317 = vmatpush.msra.mxu2 %v290_v0  ;;  %v468_v33 = vld [vmem:[#allocation11 + $0x58] sm:$0xff]  ;;  %v594_v0 = vld [vmem:[#allocation13 + $0x48] sm:$0xff] }
  0x58   :  { %651 = vmatpush.msrb.mxu1 %v640_v37  ;;  %354 = vmatpush.msra.mxu3 %v339_v32  ;;  %v466_v37 = vld [vmem:[#allocation11 + $0x48] sm:$0xff] }
  0x59   :  { %318 = vmatpush.msra.mxu2 %v289_v1  ;;  %v457_v1 = vld [vmem:[#allocation11] sm:$0xff] }
  0x5a   :  { %652 = vmatpush.msrb.mxu1 %v639_v38  ;;  %355 = vmatpush.msra.mxu3 %v338_v34  ;;  %v336_v38 = vld [vmem:[#allocation10 + $0x38] sm:$0xff] }
  0x5b   :  { %319 = vmatpush.msra.mxu2 %v288_v3  ;;  %v593_v3 = vld [vmem:[#allocation13 + $0x40] sm:$0xff]  ;;  %v802_v34 = vld [vmem:[#allocation14 + $0x98] sm:$0xff] }
  0x5c   :  { %653 = vmatpush.msrb.mxu1 %v638_v39  ;;  %v465_v39 = vld [vmem:[#allocation11 + $0x40] sm:$0xff]  ;;  %356 = vmatpush.msra.mxu3 %v337_v36 }
  0x5d   :  { %320 = vmatpush.msra.mxu2 %v287_v4  ;;  %v592_v4 = vld [vmem:[#allocation13 + $0x38] sm:$0xff]  ;;  %v1183_v36 = vld [vmem:[%s1841_s11] ss:$0 sm:$0xff] }
  0x5e   :  { %654 = vmatpush.msrb.mxu1 %v637_v40  ;;  %357 = vmatpush.msra.mxu3 %v336_v38 }
  0x5f   :  { %321 = vmatpush.msra.mxu2 %v286_v5  ;;  %v591_v5 = vld [vmem:[#allocation13 + $0x30] sm:$0xff] }
  0x60   :  { %655 = vmatpush.msrb.mxu1 %v636_v41  ;;  %v335_v41 = vld [vmem:[#allocation10 + $0x30] sm:$0xff] }
  0x61   :  { %516 = vmatpush.msrb.mxu2 %v515_v6  ;;  %358 = vmatpush.msra.mxu3 %v335_v41  ;;  %v590_v6 = vld [vmem:[#allocation13 + $0x28] sm:$0xff] }
  0x62   :  { %656 = vmatpush.msrb.mxu1 %v635_v42  ;;  %v464_v42 = vld [vmem:[#allocation11 + $0x38] sm:$0xff]  ;;  %v800_v41 = vld [vmem:[#allocation14 + $0x88] sm:$0xff] }
  0x63   :  { %517 = vmatpush.msrb.mxu2 %v514_v7  ;;  %v589_v7 = vld [vmem:[#allocation13 + $0x20] sm:$0xff] }
  0x64   :  { %657 = vmatpush.msrb.mxu1 %v634_v43  ;;  %v334_v43 = vld [vmem:[#allocation10 + $0x28] sm:$0xff] }
  0x65   :  { %518 = vmatpush.msrb.mxu2 %v513_v8  ;;  %359 = vmatpush.msra.mxu3 %v334_v43  ;;  %v588_v8 = vld [vmem:[#allocation13 + $0x18] sm:$0xff] }
  0x66   :  { %658 = vmatpush.msrb.mxu1 %v633_v44  ;;  %v463_v44 = vld [vmem:[#allocation11 + $0x30] sm:$0xff] }
  0x67   :  { %519 = vmatpush.msrb.mxu2 %v512_v9  ;;  %v587_v9 = vld [vmem:[#allocation13 + $0x10] sm:$0xff] }
  0x68   :  { %659 = vmatpush.msrb.mxu1 %v632_v45  ;;  %v333_v45 = vld [vmem:[#allocation10 + $0x20] sm:$0xff] }
  0x69   :  { %520 = vmatpush.msrb.mxu2 %v511_v10  ;;  %360 = vmatpush.msra.mxu3 %v333_v45  ;;  %v586_v10 = vld [vmem:[#allocation13 + $0x8] sm:$0xff] }
  0x6a   :  { %660 = vmatpush.msrb.mxu1 %v631_v46  ;;  %v462_v46 = vld [vmem:[#allocation11 + $0x28] sm:$0xff] }
  0x6b   :  { %521 = vmatpush.msrb.mxu2 %v510_v11  ;;  %v585_v11 = vld [vmem:[#allocation13] sm:$0xff] }
  0x6c   :  { %661 = vmatpush.msrb.mxu1 %v630_v47  ;;  %v332_v47 = vld [vmem:[#allocation10 + $0x18] sm:$0xff] }
  0x6d   :  { %522 = vmatpush.msrb.mxu2 %v509_v12  ;;  %361 = vmatpush.msra.mxu3 %v332_v47  ;;  %v1180_v12 = vld [vmem:[%s1834_s4] ss:$0 sm:$0xff] }
  0x6e   :  { %662 = vmatpush.msrb.mxu1 %v629_v48  ;;  %v461_v48 = vld [vmem:[#allocation11 + $0x20] sm:$0xff] }
  0x6f   :  { %523 = vmatpush.msrb.mxu2 %v508_v13 }
  0x70   :  { %663 = vmatpush.msrb.mxu1 %v628_v49  ;;  %v331_v49 = vld [vmem:[#allocation10 + $0x10] sm:$0xff] }
  0x71   :  { %524 = vmatpush.msrb.mxu2 %v507_v14  ;;  %362 = vmatpush.msra.mxu3 %v331_v49  ;;  %v1078_v49 = vld [vmem:[#allocation17 + $0xf8] sm:$0xff] }
  0x73   :  { %525 = vmatpush.msrb.mxu2 %v506_v15  ;;  %363 = vmatpush.msra.mxu3 %v330_v51 }
  0x75   :  { %526 = vmatpush.msrb.mxu2 %v505_v16  ;;  %364 = vmatpush.msra.mxu3 %v329_v53  ;;  %v1077_v53 = vld [vmem:[#allocation17 + $0xf0] sm:$0xff] }
  0x77   :  { %527 = vmatpush.msrb.mxu2 %v504_v17  ;;  %605 = vmatpush.msrb.mxu3 %v600_v54  ;;  %v814_v17 = vld [vmem:[#allocation14 + $0xf8] sm:$0xff] }
  0x79   :  { %528 = vmatpush.msrb.mxu2 %v503_v18  ;;  %606 = vmatpush.msrb.mxu3 %v599_v56  ;;  %v813_v18 = vld [vmem:[#allocation14 + $0xf0] sm:$0xff] }
  0x7b   :  { %529 = vmatpush.msrb.mxu2 %v502_v19  ;;  %607 = vmatpush.msrb.mxu3 %v598_v57  ;;  %v812_v19 = vld [vmem:[#allocation14 + $0xe8] sm:$0xff] }
  0x7c   :  { %v1076_v57 = vld [vmem:[#allocation17 + $0xe8] sm:$0xff] }
  0x7d   :  { %530 = vmatpush.msrb.mxu2 %v501_v20  ;;  %608 = vmatpush.msrb.mxu3 %v597_v58  ;;  %v811_v20 = vld [vmem:[#allocation14 + $0xe0] sm:$0xff] }
  0x7f   :  { %531 = vmatpush.msrb.mxu2 %v500_v21  ;;  %609 = vmatpush.msrb.mxu3 %v596_v59  ;;  %v810_v21 = vld [vmem:[#allocation14 + $0xd8] sm:$0xff] }
  0x81   :  { %610 = vmatpush.msrb.mxu3 %v595_v62 }
  0x83   :  { %611 = vmatpush.msrb.mxu3 %v594_v0  ;;  %v1075_v0 = vld [vmem:[#allocation17 + $0xe0] sm:$0xff] }
  0x85   :  { %612 = vmatpush.msrb.mxu3 %v593_v3 }
  0x87   :  { %613 = vmatpush.msrb.mxu3 %v592_v4 }
  0x89   :  { %614 = vmatpush.msrb.mxu3 %v591_v5  ;;  %v1074_v5 = vld [vmem:[#allocation17 + $0xd8] sm:$0xff] }
  0x8b   :  { %615 = vmatpush.msrb.mxu3 %v590_v6 }
  0x8d   :  { %616 = vmatpush.msrb.mxu3 %v589_v7  ;;  %v1073_v7 = vld [vmem:[#allocation17 + $0xd0] sm:$0xff] }
  0x8f   :  { %617 = vmatpush.msrb.mxu3 %v588_v8 }
  0x91   :  { %618 = vmatpush.msrb.mxu3 %v587_v9 }
  0x93   :  { %619 = vmatpush.msrb.mxu3 %v586_v10  ;;  %v1072_v10 = vld [vmem:[#allocation17 + $0xc8] sm:$0xff] }
  0x95   :  { %620 = vmatpush.msrb.mxu3 %v585_v11 }
  0xcc   :  { %v1674_v55 = vpop.f32.mrf.mxu0 }
  0xcd   :  { %404 = vmatmul.f32.vlgmr.msra.gmra.mxu1 %v1674_v55 }
  0xce   :  { %815 = vmatpush.msra.mxu1 %v814_v17  ;;  %v1069_v17 = vld [vmem:[#allocation17 + $0xb0] sm:$0xff] }
  0xd0   :  { %816 = vmatpush.msra.mxu1 %v813_v18 }
  0xd2   :  { %817 = vmatpush.msra.mxu1 %v812_v19  ;;  %v1068_v19 = vld [vmem:[#allocation17 + $0xa8] sm:$0xff] }
  0xd4   :  { %v1677_v60 = vpop.f32.mrf.mxu0  ;;  %818 = vmatpush.msra.mxu1 %v811_v20 }
  0xd5   :  { %277 = vmatpush.msrb.mxu0 %v1677_v60  ;;  %407 = vmatmul.f32.gmra.mxu1 %v1677_v60 }
  0xd6   :  { %819 = vmatpush.msra.mxu1 %v810_v21  ;;  %v1067_v21 = vld [vmem:[#allocation17 + $0xa0] sm:$0xff] }
  0xd7   :  { %278 = vmatpush.msrb.mxu0 %v1674_v55 }
  0xd8   :  { %1147 = vmatmul.msk.f32.vlgmr.msrb.gmra.mxu0 %vm256_vm0, %v1681_v61  ;;  %820 = vmatpush.msra.mxu1 %v809_v22 }
  0xd9   :  { %477 = vmatpush.msra.mxu0 %v472_v25  ;;  %v806_v25 = vld [vmem:[#allocation14 + $0xb8] sm:$0xff] }
  0xda   :  { %821 = vmatpush.msra.mxu1 %v808_v23 }
  0xdb   :  { %478 = vmatpush.msra.mxu0 %v471_v26  ;;  %v805_v26 = vld [vmem:[#allocation14 + $0xb0] sm:$0xff] }
  0xdc   :  { %822 = vmatpush.msra.mxu1 %v807_v24 }
  0xdd   :  { %664 = vmatmul.f32.vlgmr.msrb.gmra.mxu1 %v1674_v55  ;;  %479 = vmatpush.msra.mxu0 %v470_v28  ;;  %v804_v28 = vld [vmem:[#allocation14 + $0xa8] sm:$0xff] }
  0xde   :  { %823 = vmatpush.msra.mxu1 %v806_v25 }
  0xdf   :  { %480 = vmatpush.msra.mxu0 %v469_v30 }
  0xe0   :  { %1148 = vmatmul.msk.f32.gmra.mxu0 %vm256_vm0, %v1687_v2  ;;  %824 = vmatpush.msra.mxu1 %v805_v26  ;;  %v1066_v26 = vld [vmem:[#allocation17 + $0x98] sm:$0xff] }
  0xe1   :  { %481 = vmatpush.msra.mxu0 %v468_v33  ;;  %v1182_v33 = vld [vmem:[%s1845_s15] ss:$0 sm:$0xff] }
  0xe2   :  { %825 = vmatpush.msra.mxu1 %v804_v28 }
  0xe3   :  { %482 = vmatpush.msra.mxu0 %v467_v35 }
  0xe5   :  { %667 = vmatmul.f32.gmra.mxu1 %v1677_v60  ;;  %483 = vmatpush.msra.mxu0 %v466_v37  ;;  %v801_v37 = vld [vmem:[#allocation14 + $0x90] sm:$0xff] }
  0xe7   :  { %484 = vmatpush.msra.mxu0 %v465_v39 }
  0xe9   :  { %485 = vmatpush.msra.mxu0 %v464_v42 }
  0xeb   :  { %486 = vmatpush.msra.mxu0 %v463_v44  ;;  %v1184_v44 = vld [vmem:[%s1844_s14] ss:$0 sm:$0xff] }
  0xed   :  { %487 = vmatpush.msra.mxu0 %v462_v46  ;;  %v799_v46 = vld [vmem:[#allocation14 + $0x80] sm:$0xff] }
  0xef   :  { %488 = vmatpush.msra.mxu0 %v461_v48 }
  0xf1   :  { %489 = vmatpush.msra.mxu0 %v460_v50 }
  0xf3   :  { %490 = vmatpush.msra.mxu0 %v459_v52 }
  0xf5   :  { %491 = vmatpush.msra.mxu0 %v458_v63 }
  0xf7   :  { %492 = vmatpush.msra.mxu0 %v457_v1 }
 0x14a   :  { %v405_v39 = vpop.f32.mrf.mxu1 }
 0x152   :  { %v408_v1 = vpop.f32.mrf.mxu1 }
 0x155   :  { %v280_v31 = vpop.f32.mrf.mxu0 }
 0x156   :  { %322 = vmatmul.f32.vlgmr.msra.gmra.mxu2 %v280_v31  ;;  %v803_v31 = vld [vmem:[#allocation14 + $0xa0] sm:$0xff] }
 0x157   :  { %826 = vmatpush.msra.mxu1 %v803_v31  ;;  %v1179_v31 = vld [vmem:[%s1846_s16] ss:$0 sm:$0xff] }
 0x159   :  { %827 = vmatpush.msra.mxu1 %v802_v34  ;;  %v1065_v34 = vld [vmem:[#allocation17 + $0x90] sm:$0xff] }
 0x15b   :  { %828 = vmatpush.msra.mxu1 %v801_v37 }
 0x15d   :  { %v283_v40 = vpop.f32.mrf.mxu0  ;;  %829 = vmatpush.msra.mxu1 %v800_v41  ;;  %v1063_v41 = vld [vmem:[#allocation17 + $0x80] sm:$0xff] }
 0x15e   :  { %325 = vmatmul.f32.gmra.mxu2 %v283_v40 }
 0x15f   :  { %830 = vmatpush.msra.mxu1 %v799_v46 }
 0x161   :  { %1084 = vmatpush.msrb.mxu1 %v1078_v49 }
 0x163   :  { %1085 = vmatpush.msrb.mxu1 %v1077_v53 }
 0x165   :  { %1086 = vmatpush.msrb.mxu1 %v1076_v57  ;;  %v932_v57 = vld [vmem:[#allocation16 + $0x88] sm:$0xff] }
 0x166   :  { %532 = vmatmul.f32.vlgmr.msrb.gmra.mxu2 %v1674_v55 }
 0x167   :  { %1087 = vmatpush.msrb.mxu1 %v1075_v0 }
 0x169   :  { %1088 = vmatpush.msrb.mxu1 %v1074_v5 }
 0x16b   :  { %1089 = vmatpush.msrb.mxu1 %v1073_v7 }
 0x16d   :  { %1090 = vmatpush.msrb.mxu1 %v1072_v10 }
 0x16e   :  { %535 = vmatmul.f32.gmra.mxu2 %v1677_v60 }
 0x1d9   :  { %v323_v13 = vpop.f32.mrf.mxu2 }
 0x1da   :  { %v324_v14 = vadd.f32 %v1180_v12, %v323_v13  ;;  %v1071_v13 = vld [vmem:[#allocation17 + $0xc0] sm:$0xff] }
 0x1db   :  { %1091 = vmatpush.msrb.mxu1 %v1071_v13  ;;  %v723_v13 = vld [vmem:[#allocation8 + $0xf0] sm:$0xff] }
 0x1dc   :  { %365 = vmatmul.f32.vlgmr.msra.gmra.mxu3 %v324_v14  ;;  %493 = vmatmul.f32.vlgmr.msra.gmra.mxu0 %v324_v14 }
 0x1e1   :  { %v326_v15 = vpop.f32.mrf.mxu2 }
 0x1e2   :  { %v327_v16 = vadd.f32 %v1180_v12, %v326_v15 }
 0x1e4   :  { %368 = vmatmul.f32.gmra.mxu3 %v327_v16  ;;  %496 = vmatmul.f32.gmra.mxu0 %v327_v16 }
 0x1e9   :  { %v533_v29 = vpop.f32.mrf.mxu2 }
 0x1ec   :  { %621 = vmatmul.f32.vlgmr.msrb.gmra.mxu3 %v324_v14 }
 0x1f1   :  { %v536_v50 = vpop.f32.mrf.mxu2 }
 0x1f4   :  { %624 = vmatmul.f32.gmra.mxu3 %v327_v16  ;;  %v1070_v16 = vld [vmem:[#allocation17 + $0xb8] sm:$0xff] }
 0x1f5   :  { %1092 = vmatpush.msrb.mxu1 %v1070_v16 }
 0x1f7   :  { %1093 = vmatpush.msrb.mxu1 %v1069_v17 }
 0x1f9   :  { %1094 = vmatpush.msrb.mxu1 %v1068_v19 }
 0x1fb   :  { %1095 = vmatpush.msrb.mxu1 %v1067_v21 }
 0x1fd   :  { %1096 = vmatpush.msrb.mxu1 %v1066_v26  ;;  %v721_v26 = vld [vmem:[#allocation8 + $0xe0] sm:$0xff] }
 0x1ff   :  { %1097 = vmatpush.msrb.mxu1 %v1065_v34 }
 0x259   :  { %v494_v30 = vpop.f32.mrf.mxu0 }
 0x25a   :  { %v495_v32 = vadd.f32 %v1181_v27, %v494_v30 }
 0x25c   :  { %v539_v35 = vadd.f32 %v533_v29, %v495_v32  ;;  %v665_v29 = vpop.f32.mrf.mxu1 }
 0x25e   :  { %v545_v38 = vadd.f32 %v1182_v33, %v539_v35  ;;  %v1064_v35 = vld [vmem:[#allocation17 + $0x88] sm:$0xff] }
 0x25f   :  { %v366_v40 = vpop.f32.mrf.mxu3  ;;  %1098 = vmatpush.msrb.mxu1 %v1064_v35  ;;  %v717_v35 = vld [vmem:[#allocation8 + $0xc0] sm:$0xff] }
 0x260   :  { %v1151_v42 = vmul.f32 -1.442695, %v545_v38  ;;  %v367_v43 = vadd.f32 %v1183_v36, %v366_v40  ;;  %v1185_v40 = vld [vmem:[%s1843_s13] ss:$0 sm:$0xff] }
 0x261   :  { %v497_v45 = vpop.f32.mrf.mxu0  ;;  %1099 = vmatpush.msrb.mxu1 %v1063_v41  ;;  %v711_v41 = vld [vmem:[#allocation8 + $0x90] sm:$0xff] }
 0x262   :  { %1193 = vpow2.f32 %v1151_v42  ;;  %v411_v47 = vadd.f32 %v405_v39, %v367_v43  ;;  %v498_v48 = vadd.f32 %v1181_v27, %v497_v45 }
 0x264   :  { %v417_v51 = vadd.f32 %v1184_v44, %v411_v47  ;;  %v540_v52 = vadd.f32 %v536_v50, %v498_v48 }
 0x266   :  { %v1149_v54 = vmul.f32 -1.442695, %v417_v51  ;;  %v546_v56 = vadd.f32 %v1182_v33, %v540_v52 }
 0x267   :  { %v369_v58 = vpop.f32.mrf.mxu3 }
 0x268   :  { %v1194_v59 = vpop.eup %1193  ;;  %1195 = vpow2.f32 %v1149_v54  ;;  %v1152_v62 = vmul.f32 -1.442695, %v546_v56  ;;  %v370_v63 = vadd.f32 %v1183_v36, %v369_v58 }
 0x269   :  { %v1709_v3 = vadd.f32 1.0, %v1194_v59 }
 0x26a   :  { %1197 = vpow2.f32 %v1152_v62  ;;  %v412_v4 = vadd.f32 %v408_v1, %v370_v63  ;;  %v668_v63 = vpop.f32.mrf.mxu1 }
 0x26b   :  { %1199 = vrcp.f32 %v1709_v3  ;;  %v566_v50 = vand.u32 2147483648, %v1709_v3  ;;  %vm560_vm6 = vweird.f32 %v1709_v3  ;;  %v564_v54 = vand.u32 2147483647, %v1709_v3 }
 0x26c   :  { %v418_v6 = vadd.f32 %v1184_v44, %v412_v4  ;;  %v666_v44 = vadd.f32 %v1179_v31, %v665_v29  ;;  %v669_v7 = vadd.f32 %v1179_v31, %v668_v63  ;;  %v767_v63 = vld [vmem:[#allocation10 + $0xe8] sm:$0xff] }
 0x26d   :  { %v567_v4 = vor.u32 1.1754944e-38, %v566_v50  ;;  %vm565_vm10 = vcmp.eq.f32.partialorder %v564_v54, 8.507059e+37  ;;  %v938_v50 = vld [vmem:[#allocation16 + $0xb8] sm:$0xff] }
 0x26e   :  { %v1196_v8 = vpop.eup %1195  ;;  %v1150_v9 = vmul.f32 -1.442695, %v418_v6  ;;  %v934_v54 = vld [vmem:[#allocation16 + $0x98] sm:$0xff] }
 0x26f   :  { %v425_v11 = vadd.f32 1.0, %v1196_v8  ;;  %v622_v38 = vpop.f32.mrf.mxu3 }
 0x270   :  { %v1198_v12 = vpop.eup %1197  ;;  %1201 = vpow2.f32 %v1150_v9  ;;  %v623_v51 = vadd.f32 %v1185_v40, %v622_v38  ;;  %v715_v38 = vld [vmem:[#allocation8 + $0xb0] sm:$0xff] }
 0x271   :  { %1203 = vrcp.f32 %v425_v11  ;;  %v1712_v14 = vadd.f32 1.0, %v1198_v12  ;;  %v1714_v15 = vpop.eup %1199  ;;  %v438_v30 = vand.u32 2147483648, %v425_v11  ;;  %v436_v33 = vand.u32 2147483647, %v425_v11  ;;  %v724_v12 = vld [vmem:[#allocation8 + $0xf8] sm:$0xff] }
 0x272   :  { %v556_v18 = vmul.f32 %v1714_v15, %v1709_v3  ;;  %vm432_vm2 = vweird.f32 %v425_v11  ;;  %vm561_vm5 = vweird.f32 %v1714_v15  ;;  %730 = vmatpush.msra.mxu2 %v724_v12  ;;  %v762_v12 = vld [vmem:[#allocation10 + $0xc0] sm:$0xff] }
 0x273   :  { %1205 = vrcp.f32 %v1712_v14  ;;  %v439_v43 = vor.u32 1.1754944e-38, %v438_v30  ;;  %vm437_vm4 = vcmp.eq.f32.partialorder %v436_v33, 8.507059e+37  ;;  %vm1740_vm7 = vmor %vm560_vm6, %vm561_vm5  ;;  %vm575_vm14 = vweird.f32 %v1712_v14  ;;  %v720_v30 = vld [vmem:[#allocation8 + $0xd8] sm:$0xff]  ;;  %v718_v33 = vld [vmem:[#allocation8 + $0xc8] sm:$0xff] }
 0x274   :  { %v557_v25 = vsub.f32 1.0, %v556_v18  ;;  %v579_v19 = vand.u32 2147483647, %v1712_v14  ;;  %731 = vmatpush.msra.mxu2 %v723_v13  ;;  %v895_v13 = vld [vmem:[#allocation11 + $0xc8] sm:$0xff] }
 0x276   :  { %v1202_v20 = vpop.eup %1201  ;;  %v558_v37 = vmul.f32 %v1714_v15, %v557_v25 }
 0x277   :  { %v1204_v22 = vpop.eup %1203  ;;  %v1719_v23 = vadd.f32 1.0, %v1202_v20  ;;  %v625_v6 = vpop.f32.mrf.mxu3  ;;  %v722_v20 = vld [vmem:[#allocation8 + $0xe8] sm:$0xff] }
 0x278   :  { %v428_v24 = vmul.f32 %v1204_v22, %v425_v11  ;;  %vm433_vm1 = vweird.f32 %v1204_v22  ;;  %v559_v49 = vadd.f32 %v1714_v15, %v558_v37  ;;  %v626_v16 = vadd.f32 %v1185_v40, %v625_v6  ;;  %732 = vmatpush.msra.mxu2 %v722_v20  ;;  %v716_v37 = vld [vmem:[#allocation8 + $0xb8] sm:$0xff]  ;;  %v898_v6 = vld [vmem:[#allocation11 + $0xe0] sm:$0xff]  ;;  %v759_v20 = vld [vmem:[#allocation10 + $0xa8] sm:$0xff] }
 0x279   :  { %1207 = vrcp.f32 %v1719_v23  ;;  %v1722_v27 = vpop.eup %1205  ;;  %vm434_vm3 = vmor %vm432_vm2, %vm433_vm1  ;;  %v453_v56 = vand.u32 2147483648, %v1719_v23  ;;  %v451_v62 = vand.u32 2147483647, %v1719_v23  ;;  %vm447_vm9 = vweird.f32 %v1719_v23  ;;  %v712_v40 = vld [vmem:[#allocation8 + $0x98] sm:$0xff] }
 0x27a   :  { %v429_v28 = vsub.f32 1.0, %v428_v24  ;;  %v571_v36 = vmul.f32 %v1722_v27, %v1712_v14  ;;  %v563_v0 = vsel %vm1740_vm7, %v1714_v15, %v559_v49  ;;  %vm576_vm13 = vweird.f32 %v1722_v27  ;;  %733 = vmatpush.msra.mxu2 %v721_v26  ;;  %v940_v49 = vld [vmem:[#allocation16 + $0xc8] sm:$0xff]  ;;  %v756_v26 = vld [vmem:[#allocation10 + $0x90] sm:$0xff] }
 0x27b   :  { %v454_v5 = vor.u32 1.1754944e-38, %v453_v56  ;;  %v568_v8 = vsel %vm565_vm10, %v567_v4, %v563_v0  ;;  %vm452_vm12 = vcmp.eq.f32.partialorder %v451_v62, 8.507059e+37  ;;  %v581_v15 = vand.u32 2147483648, %v1712_v14  ;;  %vm577_vm15 = vmor %vm575_vm14, %vm576_vm13  ;;  %v719_v14 = vld [vmem:[#allocation8 + $0xd0] sm:$0xff]  ;;  %v901_v0 = vld [vmem:[#allocation11 + $0xf8] sm:$0xff] }
 0x27c   :  { %v430_v32 = vmul.f32 %v1204_v22, %v429_v28  ;;  %v572_v47 = vsub.f32 1.0, %v571_v36  ;;  %v677_v18 = vsub.f32 1.0, %v568_v8  ;;  %v681_v25 = vmul.f32 %v568_v8, %v1674_v55  ;;  %734 = vmatpush.msra.mxu2 %v720_v30  ;;  %v933_v56 = vld [vmem:[#allocation16 + $0x90] sm:$0xff]  ;;  %v766_v4 = vld [vmem:[#allocation10 + $0xe0] sm:$0xff]  ;;  %v755_v30 = vld [vmem:[#allocation10 + $0x88] sm:$0xff] }
 0x27d   :  { %v582_v28 = vor.u32 1.1754944e-38, %v581_v15  ;;  %vm580_vm1 = vcmp.eq.f32.partialorder %v579_v19, 8.507059e+37  ;;  %v768_v62 = vld [vmem:[#allocation10 + $0xf0] sm:$0xff]  ;;  %v761_v15 = vld [vmem:[#allocation10 + $0xb8] sm:$0xff] }
 0x27e   :  { %v431_v39 = vadd.f32 %v1204_v22, %v430_v32  ;;  %v573_v1 = vmul.f32 %v1722_v27, %v572_v47  ;;  %735 = vmatpush.msra.mxu2 %v719_v14  ;;  %v942_v47 = vld [vmem:[#allocation16 + $0xd8] sm:$0xff]  ;;  %v764_v8 = vld [vmem:[#allocation10 + $0xd0] sm:$0xff]  ;;  %v754_v14 = vld [vmem:[#allocation10 + $0x80] sm:$0xff] }
 0x27f   :  { %v1208_v42 = vpop.eup %1207  ;;  %v893_v19 = vld [vmem:[#allocation11 + $0xb8] sm:$0xff] }
 0x280   :  { %v435_v45 = vsel %vm434_vm3, %v1204_v22, %v431_v39  ;;  %v443_v46 = vmul.f32 %v1208_v42, %v1719_v23  ;;  %vm448_vm8 = vweird.f32 %v1208_v42  ;;  %v574_v11 = vadd.f32 %v1722_v27, %v573_v1  ;;  %736 = vmatpush.msra.mxu2 %v718_v33  ;;  %v714_v39 = vld [vmem:[#allocation8 + $0xa8] sm:$0xff]  ;;  %v900_v1 = vld [vmem:[#allocation11 + $0xf0] sm:$0xff] }
 0x281   :  { %v440_v48 = vsel %vm437_vm4, %v439_v43, %v435_v45  ;;  %vm449_vm11 = vmor %vm447_vm9, %vm448_vm8  ;;  %v709_v43 = vld [vmem:[#allocation8 + $0x80] sm:$0xff]  ;;  %v945_v45 = vld [vmem:[#allocation16 + $0xf0] sm:$0xff] }
 0x282   :  { %v671_v52 = vmul.f32 %v666_v44, %v440_v48  ;;  %v444_v53 = vsub.f32 1.0, %v443_v46  ;;  %v578_v24 = vsel %vm577_vm15, %v1722_v27, %v574_v11  ;;  %737 = vmatpush.msra.mxu2 %v717_v35  ;;  %v946_v44 = vld [vmem:[#allocation16 + $0xf8] sm:$0xff]  ;;  %v943_v46 = vld [vmem:[#allocation16 + $0xe0] sm:$0xff]  ;;  %v941_v48 = vld [vmem:[#allocation16 + $0xd0] sm:$0xff] }
 0x283   :  { %v583_v31 = vsel %vm580_vm1, %v582_v28, %v578_v24  ;;  %v896_v11 = vld [vmem:[#allocation11 + $0xd0] sm:$0xff]  ;;  %v757_v24 = vld [vmem:[#allocation10 + $0x98] sm:$0xff] }
 0x284   :  { %v673_v58 = vadd.f32 %v671_v52, %v623_v51  ;;  %v445_v59 = vmul.f32 %v1208_v42, %v444_v53  ;;  %v678_v32 = vsub.f32 1.0, %v583_v31  ;;  %v682_v55 = vmul.f32 %v583_v31, %v1677_v60  ;;  %738 = vmatpush.msra.mxu2 %v716_v37  ;;  %v713_v60 = vld [vmem:[#allocation8 + $0xa0] sm:$0xff]  ;;  %v937_v51 = vld [vmem:[#allocation16 + $0xb0] sm:$0xff]  ;;  %v936_v52 = vld [vmem:[#allocation16 + $0xa8] sm:$0xff] }
 0x285   :  { %v935_v53 = vld [vmem:[#allocation16 + $0xa0] sm:$0xff]  ;;  %v889_v28 = vld [vmem:[#allocation11 + $0x98] sm:$0xff]  ;;  %v888_v31 = vld [vmem:[#allocation11 + $0x90] sm:$0xff] }
 0x286   :  { %1209 = vtanh.f32 %v673_v58  ;;  %v446_v3 = vadd.f32 %v1208_v42, %v445_v59  ;;  %739 = vmatpush.msra.mxu2 %v715_v38  ;;  %v931_v58 = vld [vmem:[#allocation16 + $0x80] sm:$0xff]  ;;  %v769_v59 = vld [vmem:[#allocation10 + $0xf8] sm:$0xff]  ;;  %v1032_v33 = vld [vmem:[#allocation13 + $0xf0] sm:$0xff] }
 0x287   :  { %775 = vmatpush.msra.mxu3 %v769_v59  ;;  %v1028_v35 = vld [vmem:[#allocation13 + $0xd0] sm:$0xff]  ;;  %v887_v37 = vld [vmem:[#allocation11 + $0x88] sm:$0xff] }
 0x288   :  { %v450_v9 = vsel %vm449_vm11, %v1208_v42, %v446_v3  ;;  %740 = vmatpush.msra.mxu2 %v714_v39  ;;  %v710_v42 = vld [vmem:[#allocation8 + $0x88] sm:$0xff]  ;;  %v886_v39 = vld [vmem:[#allocation11 + $0x80] sm:$0xff] }
 0x289   :  { %v455_v10 = vsel %vm452_vm12, %v454_v5, %v450_v9  ;;  %776 = vmatpush.msra.mxu3 %v768_v62  ;;  %v899_v3 = vld [vmem:[#allocation11 + $0xe8] sm:$0xff]  ;;  %v765_v5 = vld [vmem:[#allocation10 + $0xd8] sm:$0xff] }
 0x28a   :  { %v672_v17 = vmul.f32 %v669_v7, %v455_v10  ;;  %741 = vmatpush.msra.mxu2 %v713_v60  ;;  %v897_v9 = vld [vmem:[#allocation11 + $0xd8] sm:$0xff]  ;;  %v763_v10 = vld [vmem:[#allocation10 + $0xc8] sm:$0xff]  ;;  %v1026_v60 = vld [vmem:[#allocation13 + $0xc0] sm:$0xff] }
 0x28b   :  { %777 = vmatpush.msra.mxu3 %v767_v63  ;;  %v1027_v38 = vld [vmem:[#allocation13 + $0xc8] sm:$0xff] }
 0x28c   :  { %v1210_v21 = vpop.eup %1209  ;;  %v674_v22 = vadd.f32 %v672_v17, %v626_v16  ;;  %742 = vmatpush.msra.mxu2 %v712_v40  ;;  %v894_v16 = vld [vmem:[#allocation11 + $0xc0] sm:$0xff]  ;;  %v1025_v40 = vld [vmem:[#allocation13 + $0xb8] sm:$0xff] }
 0x28d   :  { %v679_v23 = vmul.f32 %v1210_v21, %v677_v18  ;;  %778 = vmatpush.msra.mxu3 %v766_v4  ;;  %v760_v18 = vld [vmem:[#allocation10 + $0xb0] sm:$0xff]  ;;  %v1191_v4 = vld [vmem:[%s1844_s14 + $0x1] ss:$0 sm:$0xff] }
 0x28e   :  { %1211 = vtanh.f32 %v674_v22  ;;  %743 = vmatpush.msra.mxu2 %v711_v41  ;;  %v892_v21 = vld [vmem:[#allocation11 + $0xb0] sm:$0xff]  ;;  %v758_v22 = vld [vmem:[#allocation10 + $0xa0] sm:$0xff] }
 0x28f   :  { %v1757_v29 = vadd.f32 %v681_v25, %v679_v23  ;;  %779 = vmatpush.msra.mxu3 %v765_v5  ;;  %v891_v23 = vld [vmem:[#allocation11 + $0xa8] sm:$0xff]  ;;  %v890_v25 = vld [vmem:[#allocation11 + $0xa0] sm:$0xff]  ;;  %v1024_v41 = vld [vmem:[#allocation13 + $0xb0] sm:$0xff] }
 0x290   :  { %744 = vmatpush.msra.mxu2 %v710_v42  ;;  %v1023_v42 = vld [vmem:[#allocation13 + $0xa8] sm:$0xff] }
 0x291   :  { %831 = vmatmul.f32.vlgmr.msra.gmra.mxu1 %v1757_v29  ;;  %780 = vmatpush.msra.mxu3 %v764_v8 }
 0x292   :  { %745 = vmatpush.msra.mxu2 %v709_v43  ;;  %v1022_v43 = vld [vmem:[#allocation13 + $0xa0] sm:$0xff] }
 0x293   :  { %781 = vmatpush.msra.mxu3 %v763_v10 }
 0x294   :  { %v1212_v34 = vpop.eup %1211  ;;  %947 = vmatpush.msrb.mxu2 %v946_v44  ;;  %v1021_v44 = vld [vmem:[#allocation13 + $0x98] sm:$0xff] }
 0x295   :  { %v680_v27 = vmul.f32 %v1212_v34, %v678_v32  ;;  %782 = vmatpush.msra.mxu3 %v762_v12  ;;  %v1033_v32 = vld [vmem:[#allocation13 + $0xf8] sm:$0xff]  ;;  %v1031_v34 = vld [vmem:[#allocation13 + $0xe8] sm:$0xff] }
 0x296   :  { %948 = vmatpush.msrb.mxu2 %v945_v45  ;;  %v1020_v45 = vld [vmem:[#allocation13 + $0x90] sm:$0xff] }
 0x297   :  { %v1761_v36 = vadd.f32 %v682_v55, %v680_v27  ;;  %783 = vmatpush.msra.mxu3 %v761_v15  ;;  %v1030_v27 = vld [vmem:[#allocation13 + $0xe0] sm:$0xff]  ;;  %v1029_v55 = vld [vmem:[#allocation13 + $0xd8] sm:$0xff] }
 0x299   :  { %699 = vmatpush.msrb.mxu0 %v1761_v36  ;;  %834 = vmatmul.f32.gmra.mxu1 %v1761_v36 }
 0x29a   :  { %784 = vmatpush.msra.mxu3 %v760_v18 }
 0x29b   :  { %700 = vmatpush.msrb.mxu0 %v1757_v29 }
 0x29c   :  { %1153 = vmatmul.msk.f32.vlgmr.msrb.gmra.mxu0 %vm256_vm0, %v1681_v61  ;;  %v944_v61 = vld [vmem:[#allocation16 + $0xe8] sm:$0xff]  ;;  %785 = vmatpush.msra.mxu3 %v759_v20 }
 0x29d   :  { %949 = vmatpush.msrb.mxu2 %v944_v61  ;;  %907 = vmatpush.msra.mxu0 %v901_v0  ;;  %v1019_v61 = vld [vmem:[#allocation13 + $0x88] sm:$0xff] }
 0x29e   :  { %786 = vmatpush.msra.mxu3 %v758_v22 }
 0x29f   :  { %950 = vmatpush.msrb.mxu2 %v943_v46  ;;  %908 = vmatpush.msra.mxu0 %v900_v1  ;;  %v1018_v46 = vld [vmem:[#allocation13 + $0x80] sm:$0xff] }
 0x2a0   :  { %787 = vmatpush.msra.mxu3 %v757_v24 }
 0x2a1   :  { %1100 = vmatmul.f32.vlgmr.msrb.gmra.mxu1 %v1757_v29  ;;  %951 = vmatpush.msrb.mxu2 %v942_v47  ;;  %v1187_v47 = vld [vmem:[%s1834_s4 + $0x1] ss:$0 sm:$0xff] }
 0x2a2   :  { %909 = vmatpush.msra.mxu0 %v899_v3  ;;  %788 = vmatpush.msra.mxu3 %v756_v26 }
 0x2a3   :  { %952 = vmatpush.msrb.mxu2 %v941_v48 }
 0x2a4   :  { %1154 = vmatmul.msk.f32.gmra.mxu0 %vm256_vm0, %v1687_v2  ;;  %v939_v2 = vld [vmem:[#allocation16 + $0xc0] sm:$0xff]  ;;  %789 = vmatpush.msra.mxu3 %v755_v30 }
 0x2a5   :  { %953 = vmatpush.msrb.mxu2 %v940_v49  ;;  %910 = vmatpush.msra.mxu0 %v898_v6 }
 0x2a6   :  { %790 = vmatpush.msra.mxu3 %v754_v14 }
 0x2a7   :  { %954 = vmatpush.msrb.mxu2 %v939_v2  ;;  %911 = vmatpush.msra.mxu0 %v897_v9 }
 0x2a8   :  { %1039 = vmatpush.msrb.mxu3 %v1033_v32 }
 0x2a9   :  { %1103 = vmatmul.f32.gmra.mxu1 %v1761_v36  ;;  %955 = vmatpush.msrb.mxu2 %v938_v50 }
 0x2aa   :  { %912 = vmatpush.msra.mxu0 %v896_v11  ;;  %1040 = vmatpush.msrb.mxu3 %v1032_v33 }
 0x2ab   :  { %956 = vmatpush.msrb.mxu2 %v937_v51  ;;  %v1188_v51 = vld [vmem:[%s1842_s12 + $0x1] ss:$0 sm:$0xff] }
 0x2ac   :  { %913 = vmatpush.msra.mxu0 %v895_v13  ;;  %1041 = vmatpush.msrb.mxu3 %v1031_v34 }
 0x2ad   :  { %957 = vmatpush.msrb.mxu2 %v936_v52 }
 0x2ae   :  { %914 = vmatpush.msra.mxu0 %v894_v16  ;;  %1042 = vmatpush.msrb.mxu3 %v1030_v27 }
 0x2af   :  { %958 = vmatpush.msrb.mxu2 %v935_v53 }
 0x2b0   :  { %915 = vmatpush.msra.mxu0 %v893_v19  ;;  %1043 = vmatpush.msrb.mxu3 %v1029_v55 }
 0x2b1   :  { %959 = vmatpush.msrb.mxu2 %v934_v54 }
 0x2b2   :  { %916 = vmatpush.msra.mxu0 %v892_v21  ;;  %1044 = vmatpush.msrb.mxu3 %v1028_v35 }
 0x2b3   :  { %960 = vmatpush.msrb.mxu2 %v933_v56  ;;  %v1189_v56 = vld [vmem:[%s1845_s15 + $0x1] ss:$0 sm:$0xff] }
 0x2b4   :  { %917 = vmatpush.msra.mxu0 %v891_v23  ;;  %1045 = vmatpush.msrb.mxu3 %v1027_v38 }
 0x2b5   :  { %961 = vmatpush.msrb.mxu2 %v932_v57 }
 0x2b6   :  { %918 = vmatpush.msra.mxu0 %v890_v25  ;;  %1046 = vmatpush.msrb.mxu3 %v1026_v60 }
 0x2b7   :  { %962 = vmatpush.msrb.mxu2 %v931_v58  ;;  %v1190_v58 = vld [vmem:[%s1841_s11 + $0x1] ss:$0 sm:$0xff] }
 0x2b8   :  { %919 = vmatpush.msra.mxu0 %v889_v28  ;;  %1047 = vmatpush.msrb.mxu3 %v1025_v40 }
 0x2ba   :  { %920 = vmatpush.msra.mxu0 %v888_v31  ;;  %1048 = vmatpush.msrb.mxu3 %v1024_v41 }
 0x2bc   :  { %921 = vmatpush.msra.mxu0 %v887_v37  ;;  %1049 = vmatpush.msrb.mxu3 %v1023_v42  ;;  %v1186_v37 = vld [vmem:[%s1846_s16 + $0x1] ss:$0 sm:$0xff] }
 0x2be   :  { %922 = vmatpush.msra.mxu0 %v886_v39  ;;  %1050 = vmatpush.msrb.mxu3 %v1022_v43  ;;  %v1192_v43 = vld [vmem:[%s1843_s13 + $0x1] ss:$0 sm:$0xff]  ;;  %s1523_s13 = smov [#allocation19]  }
 0x2bf   :  { %s1127_s16 = sshll.u32 %s1523_s13, 4  ;;  %s1128_s16 = int_to_ptr.vmem [resolvable:$true] %s1127_s16 }
 0x2c0   :  { %1051 = vmatpush.msrb.mxu3 %v1021_v44 }
 0x2c2   :  { %1052 = vmatpush.msrb.mxu3 %v1020_v45 }
 0x2c4   :  { %1053 = vmatpush.msrb.mxu3 %v1019_v61 }
 0x2c6   :  { %1054 = vmatpush.msrb.mxu3 %v1018_v46 }
 0x30e   :  { %v832_v62 = vpop.f32.mrf.mxu1 }
 0x319   :  { %v702_v7 = vpop.f32.mrf.mxu0 }
 0x31a   :  { %746 = vmatmul.f32.vlgmr.msra.gmra.mxu2 %v702_v7 }
 0x321   :  { %v705_v17 = vpop.f32.mrf.mxu0 }
 0x322   :  { %749 = vmatmul.f32.gmra.mxu2 %v705_v17  ;;  %v835_v17 = vpop.f32.mrf.mxu1 }
 0x32a   :  { %963 = vmatmul.f32.vlgmr.msrb.gmra.mxu2 %v1757_v29  ;;  %v1101_v55 = vpop.f32.mrf.mxu1 }
 0x32b   :  { %v1102_v61 = vadd.f32 %v1186_v37, %v1101_v55 }
 0x332   :  { %966 = vmatmul.f32.gmra.mxu2 %v1761_v36 }
 0x39d   :  { %v747_v48 = vpop.f32.mrf.mxu2 }
 0x39e   :  { %v748_v49 = vadd.f32 %v1187_v47, %v747_v48 }
 0x3a0   :  { %791 = vmatmul.f32.vlgmr.msra.gmra.mxu3 %v748_v49  ;;  %923 = vmatmul.f32.vlgmr.msra.gmra.mxu0 %v748_v49 }
 0x3a5   :  { %v750_v2 = vpop.f32.mrf.mxu2 }
 0x3a6   :  { %v751_v50 = vadd.f32 %v1187_v47, %v750_v2 }
 0x3a8   :  { %794 = vmatmul.f32.gmra.mxu3 %v751_v50  ;;  %926 = vmatmul.f32.gmra.mxu0 %v751_v50 }
 0x3ad   :  { %v964_v52 = vpop.f32.mrf.mxu2 }
 0x3b0   :  { %1055 = vmatmul.f32.vlgmr.msrb.gmra.mxu3 %v748_v49 }
 0x3b5   :  { %v967_v7 = vpop.f32.mrf.mxu2 }
 0x3b8   :  { %1058 = vmatmul.f32.gmra.mxu3 %v751_v50 }
 0x41d   :  { %v924_v53 = vpop.f32.mrf.mxu0 }
 0x41e   :  { %v925_v54 = vadd.f32 %v1188_v51, %v924_v53 }
 0x420   :  { %v970_v57 = vadd.f32 %v964_v52, %v925_v54 }
 0x422   :  { %v977_v59 = vadd.f32 %v1189_v56, %v970_v57 }
 0x423   :  { %v792_v63 = vpop.f32.mrf.mxu3 }
 0x424   :  { %v1162_v0 = vmul.f32 -1.442695, %v977_v59  ;;  %v793_v1 = vadd.f32 %v1190_v58, %v792_v63  ;;  %v1104_v63 = vpop.f32.mrf.mxu1 }
 0x425   :  { %v927_v3 = vpop.f32.mrf.mxu0 }
 0x426   :  { %1213 = vpow2.f32 %v1162_v0  ;;  %v838_v5 = vadd.f32 %v832_v62, %v793_v1  ;;  %v928_v6 = vadd.f32 %v1188_v51, %v927_v3 }
 0x428   :  { %v845_v8 = vadd.f32 %v1191_v4, %v838_v5  ;;  %v971_v9 = vadd.f32 %v967_v7, %v928_v6  ;;  %v1105_v7 = vadd.f32 %v1186_v37, %v1104_v63 }
 0x42a   :  { %v1158_v10 = vmul.f32 -1.442695, %v845_v8  ;;  %v978_v11 = vadd.f32 %v1189_v56, %v971_v9 }
 0x42b   :  { %v795_v12 = vpop.f32.mrf.mxu3 }
 0x42c   :  { %v1214_v13 = vpop.eup %1213  ;;  %1215 = vpow2.f32 %v1158_v10  ;;  %v1163_v15 = vmul.f32 -1.442695, %v978_v11  ;;  %v796_v16 = vadd.f32 %v1190_v58, %v795_v12 }
 0x42d   :  { %v1789_v18 = vadd.f32 1.0, %v1214_v13 }
 0x42e   :  { %1217 = vpow2.f32 %v1163_v15  ;;  %v839_v19 = vadd.f32 %v835_v17, %v796_v16 }
 0x42f   :  { %1219 = vrcp.f32 %v1789_v18  ;;  %v998_v53 = vand.u32 2147483648, %v1789_v18  ;;  %vm992_vm6 = vweird.f32 %v1789_v18  ;;  %v996_v56 = vand.u32 2147483647, %v1789_v18 }
 0x430   :  { %v846_v20 = vadd.f32 %v1191_v4, %v839_v19 }
 0x431   :  { %v999_v3 = vor.u32 1.1754944e-38, %v998_v53  ;;  %vm997_vm11 = vcmp.eq.f32.partialorder %v996_v56, 8.507059e+37 }
 0x432   :  { %v1216_v21 = vpop.eup %1215  ;;  %v1159_v22 = vmul.f32 -1.442695, %v846_v20 }
 0x433   :  { %v853_v23 = vadd.f32 1.0, %v1216_v21  ;;  %v1056_v40 = vpop.f32.mrf.mxu3 }
 0x434   :  { %v1218_v24 = vpop.eup %1217  ;;  %1221 = vpow2.f32 %v1159_v22  ;;  %v1057_v50 = vadd.f32 %v1192_v43, %v1056_v40 }
 0x435   :  { %1223 = vrcp.f32 %v853_v23  ;;  %v1792_v25 = vadd.f32 1.0, %v1218_v24  ;;  %v1220_v26 = vpop.eup %1219  ;;  %v866_v35 = vand.u32 2147483648, %v853_v23  ;;  %v864_v39 = vand.u32 2147483647, %v853_v23 }
 0x436   :  { %v988_v28 = vmul.f32 %v1220_v26, %v1789_v18  ;;  %vm860_vm2 = vweird.f32 %v853_v23  ;;  %vm993_vm5 = vweird.f32 %v1220_v26 }
 0x437   :  { %1225 = vrcp.f32 %v1792_v25  ;;  %v867_v45 = vor.u32 1.1754944e-38, %v866_v35  ;;  %vm865_vm4 = vcmp.eq.f32.partialorder %v864_v39, 8.507059e+37  ;;  %vm1809_vm8 = vmor %vm992_vm6, %vm993_vm5  ;;  %v1013_v15 = vand.u32 2147483648, %v1792_v25 }
 0x438   :  { %v989_v33 = vsub.f32 1.0, %v988_v28  ;;  %vm1007_vm14 = vweird.f32 %v1792_v25  ;;  %v1011_v16 = vand.u32 2147483647, %v1792_v25 }
 0x43a   :  { %v1222_v30 = vpop.eup %1221  ;;  %v990_v41 = vmul.f32 %v1220_v26, %v989_v33  ;;  %vm1012_vm1 = vcmp.eq.f32.partialorder %v1011_v16, 8.507059e+37 }
 0x43b   :  { %v1224_v31 = vpop.eup %1223  ;;  %v854_v14 = vadd.f32 1.0, %v1222_v30  ;;  %v1059_v6 = vpop.f32.mrf.mxu3 }
 0x43c   :  { %v856_v32 = vmul.f32 %v1224_v31, %v853_v23  ;;  %vm861_vm0 = vweird.f32 %v1224_v31  ;;  %v991_v2 = vadd.f32 %v1220_v26, %v990_v41  ;;  %v1060_v12 = vadd.f32 %v1192_v43, %v1059_v6 }
 0x43d   :  { %1227 = vrcp.f32 %v854_v14  ;;  %v1796_v34 = vpop.eup %1225  ;;  %vm862_vm3 = vmor %vm860_vm2, %vm861_vm0  ;;  %v881_v54 = vand.u32 2147483648, %v854_v14  ;;  %v879_v59 = vand.u32 2147483647, %v854_v14  ;;  %vm875_vm9 = vweird.f32 %v854_v14 }
 0x43e   :  { %v857_v27 = vsub.f32 1.0, %v856_v32  ;;  %v1003_v60 = vmul.f32 %v1796_v34, %v1792_v25  ;;  %v995_v0 = vsel %vm1809_vm8, %v1220_v26, %v991_v2  ;;  %vm1008_vm13 = vweird.f32 %v1796_v34 }
 0x43f   :  { %v882_v5 = vor.u32 1.1754944e-38, %v881_v54  ;;  %vm880_vm12 = vcmp.eq.f32.partialorder %v879_v59, 8.507059e+37  ;;  %v1000_v9 = vsel %vm997_vm11, %v999_v3, %v995_v0  ;;  %vm1009_vm15 = vmor %vm1007_vm14, %vm1008_vm13  ;;  %v1014_v23 = vor.u32 1.1754944e-38, %v1013_v15 }
 0x440   :  { %v858_v38 = vmul.f32 %v1224_v31, %v857_v27  ;;  %v1004_v48 = vsub.f32 1.0, %v1003_v60  ;;  %v1113_v17 = vsub.f32 1.0, %v1000_v9  ;;  %v1117_v22 = vmul.f32 %v1000_v9, %v1757_v29 }
 0x442   :  { %v859_v42 = vadd.f32 %v1224_v31, %v858_v38  ;;  %v1005_v1 = vmul.f32 %v1796_v34, %v1004_v48 }
 0x443   :  { %v1228_v44 = vpop.eup %1227 }
 0x444   :  { %v863_v46 = vsel %vm862_vm3, %v1224_v31, %v859_v42  ;;  %v871_v47 = vmul.f32 %v1228_v44, %v854_v14  ;;  %vm876_vm7 = vweird.f32 %v1228_v44  ;;  %v1006_v11 = vadd.f32 %v1796_v34, %v1005_v1 }
 0x445   :  { %v868_v49 = vsel %vm865_vm4, %v867_v45, %v863_v46  ;;  %vm877_vm10 = vmor %vm875_vm9, %vm876_vm7 }
 0x446   :  { %v1107_v51 = vmul.f32 %v1102_v61, %v868_v49  ;;  %v872_v52 = vsub.f32 1.0, %v871_v47  ;;  %v1010_v20 = vsel %vm1009_vm15, %v1796_v34, %v1006_v11 }
 0x447   :  { %v1015_v26 = vsel %vm1012_vm1, %v1014_v23, %v1010_v20 }
 0x448   :  { %v1109_v57 = vadd.f32 %v1107_v51, %v1057_v50  ;;  %v873_v58 = vmul.f32 %v1228_v44, %v872_v52  ;;  %v1114_v28 = vsub.f32 1.0, %v1015_v26  ;;  %v1118_v31 = vmul.f32 %v1015_v26, %v1761_v36 }
 0x44a   :  { %1229 = vtanh.f32 %v1109_v57  ;;  %v874_v4 = vadd.f32 %v1228_v44, %v873_v58 }
 0x44c   :  { %v878_v8 = vsel %vm877_vm10, %v1228_v44, %v874_v4 }
 0x44d   :  { %v883_v10 = vsel %vm880_vm12, %v882_v5, %v878_v8 }
 0x44e   :  { %v1108_v13 = vmul.f32 %v1105_v7, %v883_v10 }
 0x450   :  { %v1230_v18 = vpop.eup %1229  ;;  %v1110_v19 = vadd.f32 %v1108_v13, %v1060_v12 }
 0x451   :  { %v1115_v21 = vmul.f32 %v1230_v18, %v1113_v17 }
 0x452   :  { %1231 = vtanh.f32 %v1110_v19 }
 0x453   :  { %v1119_v24 = vadd.f32 %v1117_v22, %v1115_v21 }
 0x455   :  { %1121 = vst [vmem:[#allocation19] sm:$0xff] %v1119_v24 }
 0x458   :  { %v1232_v30 = vpop.eup %1231 }
 0x459   :  { %v1116_v25 = vmul.f32 %v1232_v30, %v1114_v28 }
 0x45b   :  { %v1120_v14 = vadd.f32 %v1118_v31, %v1116_v25 }
 0x45d   :  { %1122 = vst [vmem:[#allocation19 + $0x8] sm:$0xff] %v1120_v14 }
 0x45e   :  { %1135 = dma.vmem_to_hbm [thread:$0]  %s1128_s16, 256, %s1130_s2, [#allocation4], %s1512_s19, %s1512_s19, %s1513_s1  }
 0x45f   :  { %1509 = dma.done.wait [#allocation4], 256  }
 0x460   :  { %1510 = vsyncadd [#allocation4], 4294967040 }
 0x461   :  { %1140 = vsyncpa [#allocation3], 1 }
 0x462   :  { %1141 = vsyncpa [#allocation6], 1 }
 0x463   :  { %1142 = vsyncpa [#allocation9], 1 }
 0x464   :  { %1143 = vsyncpa [#allocation12], 1 }
 0x465   :  { %1144 = vsyncpa [#allocation15], 1 }
 0x466   :  { %1145 = vsyncpa [#allocation18], 1 }
 0x467   :  { %1146 = vsyncpa [#allocation4], 1 }

</bundles_post_ra>
